<compile_context>
chip_gen: v7x
topology: tpu7x:2x2x1
jax: 0.10.0
libtpu: 0.0.40
codegen_flags: <defaults>
</compile_context>

<pallas_src>
import functools

import jax
import jax.numpy as jnp
from jax.experimental import pallas as pl
from jax.experimental.pallas import tpu as pltpu


def _gru_encoder_kernel(emb_ref, wih_ref, whh_ref, bih_ref, bhh_ref,
                        wfc_ref, bfc_ref,
                        out_ref, hid_ref,
                        *, enc_hid_dim, seq_len, batch):
    """Single grid step: fused bidirectional GRU recurrence + final fc/tanh.

    Shapes (all VMEM-resident for the single grid step):
      emb_ref : (T*Bp, E)      flattened seq-major embedded input (batch padded)
      wih_ref : (E, 6H)        [W_ih_fwd^T | W_ih_bwd^T] concatenated on lanes
      whh_ref : (2H, 6H)       block-diagonal [W_hh_fwd^T  0 ; 0  W_hh_bwd^T]
      bih_ref : (1, 6H)        [b_ih_fwd | b_ih_bwd]
      bhh_ref : (1, 6H)        [b_hh_fwd | b_hh_bwd]
      wfc_ref : (2H, D)        fc weight, applied to [h_fwd_final | h_bwd_final]
      bfc_ref : (1, D)
      out_ref : (T*Bp, 2H)     lane-dense output slab ([fwd | bwd] on lanes)
      hid_ref : (Bp, D)
    """
    H = enc_hid_dim
    H3 = 3 * H
    T = seq_len
    B = batch                                   # padded batch (multiple of 8)

    emb2d = emb_ref[...]                        # (T*B, E)
    wih = wih_ref[...]                          # (E, 6H)
    whh = whh_ref[...]                          # (2H, 6H) block-diagonal
    bih = bih_ref[...]                          # (1, 6H)
    bhh = bhh_ref[...]                          # (1, 6H)

    # Hoisted input projection for BOTH directions and ALL timesteps:
    # a single MXU pass, kept in registers (a handful of vregs at these sizes).
    gx_all = jnp.dot(emb2d, wih, preferred_element_type=jnp.float32) + bih  # (T*B, 6H)

    # Fused carry: h = [h_fwd | h_bwd]  (B, 2H)
    h = jnp.zeros((B, 2 * H), jnp.float32)

    for t in range(T):                          # static unroll, T small
        row_f = t * B                           # forward reads time t
        row_b = (T - 1 - t) * B                 # backward reads time T-1-t

        gx_f = gx_all[row_f:row_f + B, 0:H3]            # (B, 3H)
        gx_b = gx_all[row_b:row_b + B, H3:2 * H3]       # (B, 3H)

        # Single recurrent matmul for both directions (serial critical path).
        gh = jnp.dot(h, whh, preferred_element_type=jnp.float32) + bhh      # (B, 6H)

        # PyTorch GRU gate order [r, z, n]; all gate math f32 (VPU/EUP path).
        # Forward direction (columns 0:3H of gh).
        r_f = jax.nn.sigmoid(gx_f[:, 0:H] + gh[:, 0:H])
        z_f = jax.nn.sigmoid(gx_f[:, H:2 * H] + gh[:, H:2 * H])
        n_f = jnp.tanh(gx_f[:, 2 * H:3 * H] + r_f * gh[:, 2 * H:3 * H])
        h_f = (1.0 - z_f) * n_f + z_f * h[:, 0:H]

        # Backward direction (columns 3H:6H of gh).
        r_b = jax.nn.sigmoid(gx_b[:, 0:H] + gh[:, H3 + 0:H3 + H])
        z_b = jax.nn.sigmoid(gx_b[:, H:2 * H] + gh[:, H3 + H:H3 + 2 * H])
        n_b = jnp.tanh(gx_b[:, 2 * H:3 * H] + r_b * gh[:, H3 + 2 * H:H3 + 3 * H])
        h_b = (1.0 - z_b) * n_b + z_b * h[:, H:2 * H]

        # Direct sublane-aligned stores into the output slab (no staging copy).
        out_ref[row_f:row_f + B, 0:H] = h_f.astype(out_ref.dtype)
        out_ref[row_b:row_b + B, H:2 * H] = h_b.astype(out_ref.dtype)

        h = jnp.concatenate([h_f, h_b], axis=1)         # (B, 2H)

    # hidden = tanh([h_fwd_final | h_bwd_final] @ W_fc^T + b_fc); h already is
    # the concatenation in the right order, so a single MXU pass suffices.
    hid = jnp.tanh(jnp.dot(h, wfc_ref[...], preferred_element_type=jnp.float32)
                   + bfc_ref[...])
    hid_ref[...] = hid.astype(hid_ref.dtype)


def gru_encoder_pallas(embedded, params, enc_hid_dim, dec_hid_dim):
    """embedded: (T, B, E) float32.  Returns (outputs (T,B,2H), hidden (B,D))."""
    T, B, E = embedded.shape
    H = enc_hid_dim
    D = dec_hid_dim

    # Sublane-pad the batch so every per-step access is 8-row aligned.
    Bp = ((B + 7) // 8) * 8
    if Bp != B:
        embedded = jnp.pad(embedded, ((0, 0), (0, Bp - B), (0, 0)))
    emb2d = embedded.reshape(T * Bp, E)            # row-major flatten (free)

    kernel = functools.partial(_gru_encoder_kernel,
                               enc_hid_dim=H, seq_len=T, batch=Bp)

    out2d, hidden = pl.pallas_call(
        kernel,
        out_shape=(
            jax.ShapeDtypeStruct((T * Bp, 2 * H), jnp.float32),   # outputs slab
            jax.ShapeDtypeStruct((Bp, D), jnp.float32),           # final hidden
        ),
        grid=(1,),
        in_specs=[
            pl.BlockSpec((T * Bp, E), lambda i: (0, 0)),          # embedded
            pl.BlockSpec((E, 6 * H), lambda i: (0, 0)),           # W_ih cat
            pl.BlockSpec((2 * H, 6 * H), lambda i: (0, 0)),       # W_hh block-diag
            pl.BlockSpec((1, 6 * H), lambda i: (0, 0)),           # b_ih cat
            pl.BlockSpec((1, 6 * H), lambda i: (0, 0)),           # b_hh cat
            pl.BlockSpec((2 * H, D), lambda i: (0, 0)),           # W_fc^T
            pl.BlockSpec((1, D), lambda i: (0, 0)),               # b_fc
        ],
        out_specs=(
            pl.BlockSpec((T * Bp, 2 * H), lambda i: (0, 0)),
            pl.BlockSpec((Bp, D), lambda i: (0, 0)),
        ),
        compiler_params=pltpu.CompilerParams(
            dimension_semantics=("arbitrary",)),
    )(emb2d, params["wih_cat"], params["whh_blk"], params["bih_cat"],
      params["bhh_cat"], params["wfc_t"], params["bfc"])

    outputs = out2d.reshape(T, Bp, 2 * H)[:, :B, :]    # drop padded batch rows
    hidden = hidden[:B, :]
    return outputs, hidden


def encoder_forward(src, params, enc_hid_dim, dec_hid_dim):
    """src: (T, B) int32 token ids.  Mirrors Encoder.forward (eval mode)."""
    embedded = params["embedding"][src]    # (T, B, E); dropout = identity (eval)
    return gru_encoder_pallas(embedded.astype(jnp.float32), params,
                              enc_hid_dim, dec_hid_dim)


# ----------------------------- reference (pure JAX) ----------------------------

def _ref_gru_dir(emb, w_ih, w_hh, b_ih, b_hh, reverse, H):
    T, B, _ = emb.shape
    xs = emb[::-1] if reverse else emb
    h = jnp.zeros((B, H), jnp.float32)
    outs = []
    for t in range(T):
        x = xs[t]
        gx = x @ w_ih.T + b_ih
        gh = h @ w_hh.T + b_hh
        r = jax.nn.sigmoid(gx[:, :H] + gh[:, :H])
        z = jax.nn.sigmoid(gx[:, H:2 * H] + gh[:, H:2 * H])
        n = jnp.tanh(gx[:, 2 * H:] + r * gh[:, 2 * H:])
        h = (1.0 - z) * n + z * h
        outs.append(h)
    outs = jnp.stack(outs)
    if reverse:
        outs = outs[::-1]
    return outs, h


def encoder_reference(src, params, raw, enc_hid_dim, dec_hid_dim):
    H = enc_hid_dim
    emb = params["embedding"][src].astype(jnp.float32)
    of, hf = _ref_gru_dir(emb, raw["wih"][0], raw["whh"][0], raw["bih"][0], raw["bhh"][0], False, H)
    ob, hb = _ref_gru_dir(emb, raw["wih"][1], raw["whh"][1], raw["bih"][1], raw["bhh"][1], True, H)
    outputs = jnp.concatenate([of, ob], axis=-1)
    hidden = jnp.tanh(jnp.concatenate([hf, hb], axis=1) @ raw["wfc"].T + raw["bfc"])
    return outputs, hidden


# ------------------------------------- main -------------------------------------

if __name__ == "__main__":
    # Module config (small shapes)
    input_dim = 50      # vocab size
    emb_dim = 32
    enc_hid_dim = 16
    dec_hid_dim = 32
    T, B = 8, 2         # seq_len, batch (PyTorch GRU default: seq-major)
    H = enc_hid_dim

    key = jax.random.PRNGKey(0)
    ks = jax.random.split(key, 8)

    embedding = 0.1 * jax.random.normal(ks[0], (input_dim, emb_dim), jnp.float32)
    wih = 0.1 * jax.random.normal(ks[1], (2, 3 * H, emb_dim), jnp.float32)
    whh = 0.1 * jax.random.normal(ks[2], (2, 3 * H, H), jnp.float32)
    bih = 0.1 * jax.random.normal(ks[3], (2, 3 * H), jnp.float32)
    bhh = 0.1 * jax.random.normal(ks[4], (2, 3 * H), jnp.float32)
    wfc = 0.1 * jax.random.normal(ks[5], (dec_hid_dim, 2 * H), jnp.float32)
    bfc = 0.1 * jax.random.normal(ks[6], (dec_hid_dim,), jnp.float32)

    # Fused / pre-transposed parameter layouts for the kernel.
    wih_cat = jnp.concatenate([wih[0].T, wih[1].T], axis=1)          # (E, 6H)
    whh_blk = jnp.zeros((2 * H, 6 * H), jnp.float32)
    whh_blk = whh_blk.at[:H, :3 * H].set(whh[0].T)                   # fwd block
    whh_blk = whh_blk.at[H:, 3 * H:].set(whh[1].T)                   # bwd block
    bih_cat = jnp.concatenate([bih[0], bih[1]])[None, :]             # (1, 6H)
    bhh_cat = jnp.concatenate([bhh[0], bhh[1]])[None, :]             # (1, 6H)

    params = {
        "embedding": embedding,
        "wih_cat": wih_cat,
        "whh_blk": whh_blk,
        "bih_cat": bih_cat,
        "bhh_cat": bhh_cat,
        "wfc_t": wfc.T,                                              # (2H, D)
        "bfc": bfc[None, :],                                         # (1, D)
    }
    raw = {"wih": wih, "whh": whh, "bih": bih, "bhh": bhh, "wfc": wfc, "bfc": bfc}

    src = jax.random.randint(ks[7], (T, B), 0, input_dim, jnp.int32)

    outputs, hidden = encoder_forward(src, params, enc_hid_dim, dec_hid_dim)
    jax.block_until_ready((outputs, hidden))

    outputs_ref, hidden_ref = encoder_reference(src, params, raw, enc_hid_dim, dec_hid_dim)
    assert outputs.shape == (T, B, 2 * enc_hid_dim)
    assert hidden.shape == (B, dec_hid_dim)
    assert jnp.allclose(outputs, outputs_ref, atol=1e-5), "outputs mismatch"
    assert jnp.allclose(hidden, hidden_ref, atol=1e-5), "hidden mismatch"

    print("KERNEL_OK")
</pallas_src>

<mosaic_0001>
module attributes {stable_mosaic.version = 11 : i64} {
  func.func @_gru_encoder_kernel(%arg0: i32, %arg1: memref<64x32xf32, #tpu.memory_space<vmem>>, %arg2: memref<32x96xf32, #tpu.memory_space<vmem>>, %arg3: memref<32x96xf32, #tpu.memory_space<vmem>>, %arg4: memref<1x96xf32, #tpu.memory_space<vmem>>, %arg5: memref<1x96xf32, #tpu.memory_space<vmem>>, %arg6: memref<32x32xf32, #tpu.memory_space<vmem>>, %arg7: memref<1x32xf32, #tpu.memory_space<vmem>>, %arg8: memref<64x32xf32, #tpu.memory_space<vmem>>, %arg9: memref<8x32xf32, #tpu.memory_space<vmem>>) attributes {dimension_semantics = [#tpu.dimension_semantics<arbitrary>], iteration_bounds = array<i64: 1>, scalar_prefetch = 0 : i64, scratch_operands = 0 : i64, tpu.core_type = #tpu.core_type<tc>, window_params = [{pipeline_mode = #tpu.pipeline_mode<synchronous>, transform_indices = @transform_0, window_bounds = array<i64: 64, 32>}, {pipeline_mode = #tpu.pipeline_mode<synchronous>, transform_indices = @transform_1, window_bounds = array<i64: 32, 96>}, {pipeline_mode = #tpu.pipeline_mode<synchronous>, transform_indices = @transform_2, window_bounds = array<i64: 32, 96>}, {pipeline_mode = #tpu.pipeline_mode<synchronous>, transform_indices = @transform_3, window_bounds = array<i64: 1, 96>}, {pipeline_mode = #tpu.pipeline_mode<synchronous>, transform_indices = @transform_4, window_bounds = array<i64: 1, 96>}, {pipeline_mode = #tpu.pipeline_mode<synchronous>, transform_indices = @transform_5, window_bounds = array<i64: 32, 32>}, {pipeline_mode = #tpu.pipeline_mode<synchronous>, transform_indices = @transform_6, window_bounds = array<i64: 1, 32>}, {pipeline_mode = #tpu.pipeline_mode<synchronous>, transform_indices = @transform_7, window_bounds = array<i64: 64, 32>}, {pipeline_mode = #tpu.pipeline_mode<synchronous>, transform_indices = @transform_8, window_bounds = array<i64: 8, 32>}]} {
    %c0 = arith.constant 0 : index
    %c0_0 = arith.constant 0 : index
    %0 = vector.load %arg1[%c0, %c0_0] : memref<64x32xf32, #tpu.memory_space<vmem>>, vector<64x32xf32>
    %c0_1 = arith.constant 0 : index
    %c0_2 = arith.constant 0 : index
    %1 = vector.load %arg2[%c0_1, %c0_2] : memref<32x96xf32, #tpu.memory_space<vmem>>, vector<32x96xf32>
    %c0_3 = arith.constant 0 : index
    %c0_4 = arith.constant 0 : index
    %2 = vector.load %arg3[%c0_3, %c0_4] : memref<32x96xf32, #tpu.memory_space<vmem>>, vector<32x96xf32>
    %c0_5 = arith.constant 0 : index
    %c0_6 = arith.constant 0 : index
    %3 = vector.load %arg4[%c0_5, %c0_6] : memref<1x96xf32, #tpu.memory_space<vmem>>, vector<1x96xf32>
    %c0_7 = arith.constant 0 : index
    %c0_8 = arith.constant 0 : index
    %4 = vector.load %arg5[%c0_7, %c0_8] : memref<1x96xf32, #tpu.memory_space<vmem>>, vector<1x96xf32>
    %cst = arith.constant dense<0.000000e+00> : vector<64x96xf32>
    %5 = tpu.matmul %0, %1, %cst {dimension_numbers = #tpu.dot_dimension_numbers<[1], [0], [0], [1], [0, 0, 1, 1], [], []>} : vector<64x32xf32>, vector<32x96xf32>, vector<64x96xf32> -> vector<64x96xf32>
    %6 = vector.broadcast %3 : vector<1x96xf32> to vector<64x96xf32>
    %7 = arith.addf %5, %6 : vector<64x96xf32>
    %cst_9 = arith.constant 0.000000e+00 : f32
    %8 = vector.broadcast %cst_9 : f32 to vector<8x32xf32>
    %9 = vector.extract_strided_slice %7 {offsets = [0, 0], sizes = [8, 48], strides = [1, 1]} : vector<64x96xf32> to vector<8x48xf32>
    %10 = vector.extract_strided_slice %7 {offsets = [56, 48], sizes = [8, 48], strides = [1, 1]} : vector<64x96xf32> to vector<8x48xf32>
    %cst_10 = arith.constant dense<0.000000e+00> : vector<8x96xf32>
    %11 = tpu.matmul %8, %2, %cst_10 {dimension_numbers = #tpu.dot_dimension_numbers<[1], [0], [0], [1], [0, 0, 1, 1], [], []>} : vector<8x32xf32>, vector<32x96xf32>, vector<8x96xf32> -> vector<8x96xf32>
    %12 = vector.broadcast %4 : vector<1x96xf32> to vector<8x96xf32>
    %13 = arith.addf %11, %12 : vector<8x96xf32>
    %14 = vector.extract_strided_slice %9 {offsets = [0, 0], sizes = [8, 16], strides = [1, 1]} : vector<8x48xf32> to vector<8x16xf32>
    %15 = vector.extract_strided_slice %13 {offsets = [0, 0], sizes = [8, 16], strides = [1, 1]} : vector<8x96xf32> to vector<8x16xf32>
    %16 = arith.addf %14, %15 : vector<8x16xf32>
    %17 = arith.negf %16 : vector<8x16xf32>
    %18 = math.exp %17 : vector<8x16xf32>
    %cst_11 = arith.constant 1.000000e+00 : f32
    %19 = vector.broadcast %cst_11 : f32 to vector<8x16xf32>
    %20 = arith.addf %19, %18 : vector<8x16xf32>
    %21 = arith.divf %19, %20 : vector<8x16xf32>
    %22 = vector.extract_strided_slice %9 {offsets = [0, 16], sizes = [8, 16], strides = [1, 1]} : vector<8x48xf32> to vector<8x16xf32>
    %23 = vector.extract_strided_slice %13 {offsets = [0, 16], sizes = [8, 16], strides = [1, 1]} : vector<8x96xf32> to vector<8x16xf32>
    %24 = arith.addf %22, %23 : vector<8x16xf32>
    %25 = arith.negf %24 : vector<8x16xf32>
    %26 = math.exp %25 : vector<8x16xf32>
    %cst_12 = arith.constant 1.000000e+00 : f32
    %27 = vector.broadcast %cst_12 : f32 to vector<8x16xf32>
    %28 = arith.addf %27, %26 : vector<8x16xf32>
    %29 = arith.divf %27, %28 : vector<8x16xf32>
    %30 = vector.extract_strided_slice %9 {offsets = [0, 32], sizes = [8, 16], strides = [1, 1]} : vector<8x48xf32> to vector<8x16xf32>
    %31 = vector.extract_strided_slice %13 {offsets = [0, 32], sizes = [8, 16], strides = [1, 1]} : vector<8x96xf32> to vector<8x16xf32>
    %32 = arith.mulf %21, %31 : vector<8x16xf32>
    %33 = arith.addf %30, %32 : vector<8x16xf32>
    %34 = math.tanh %33 : vector<8x16xf32>
    %cst_13 = arith.constant 1.000000e+00 : f32
    %35 = vector.broadcast %cst_13 : f32 to vector<8x16xf32>
    %36 = arith.subf %35, %29 : vector<8x16xf32>
    %37 = arith.mulf %36, %34 : vector<8x16xf32>
    %38 = vector.extract_strided_slice %8 {offsets = [0, 0], sizes = [8, 16], strides = [1, 1]} : vector<8x32xf32> to vector<8x16xf32>
    %39 = arith.mulf %29, %38 : vector<8x16xf32>
    %40 = arith.addf %37, %39 : vector<8x16xf32>
    %41 = vector.extract_strided_slice %10 {offsets = [0, 0], sizes = [8, 16], strides = [1, 1]} : vector<8x48xf32> to vector<8x16xf32>
    %42 = vector.extract_strided_slice %13 {offsets = [0, 48], sizes = [8, 16], strides = [1, 1]} : vector<8x96xf32> to vector<8x16xf32>
    %43 = arith.addf %41, %42 : vector<8x16xf32>
    %44 = arith.negf %43 : vector<8x16xf32>
    %45 = math.exp %44 : vector<8x16xf32>
    %cst_14 = arith.constant 1.000000e+00 : f32
    %46 = vector.broadcast %cst_14 : f32 to vector<8x16xf32>
    %47 = arith.addf %46, %45 : vector<8x16xf32>
    %48 = arith.divf %46, %47 : vector<8x16xf32>
    %49 = vector.extract_strided_slice %10 {offsets = [0, 16], sizes = [8, 16], strides = [1, 1]} : vector<8x48xf32> to vector<8x16xf32>
    %50 = vector.extract_strided_slice %13 {offsets = [0, 64], sizes = [8, 16], strides = [1, 1]} : vector<8x96xf32> to vector<8x16xf32>
    %51 = arith.addf %49, %50 : vector<8x16xf32>
    %52 = arith.negf %51 : vector<8x16xf32>
    %53 = math.exp %52 : vector<8x16xf32>
    %cst_15 = arith.constant 1.000000e+00 : f32
    %54 = vector.broadcast %cst_15 : f32 to vector<8x16xf32>
    %55 = arith.addf %54, %53 : vector<8x16xf32>
    %56 = arith.divf %54, %55 : vector<8x16xf32>
    %57 = vector.extract_strided_slice %10 {offsets = [0, 32], sizes = [8, 16], strides = [1, 1]} : vector<8x48xf32> to vector<8x16xf32>
    %58 = vector.extract_strided_slice %13 {offsets = [0, 80], sizes = [8, 16], strides = [1, 1]} : vector<8x96xf32> to vector<8x16xf32>
    %59 = arith.mulf %48, %58 : vector<8x16xf32>
    %60 = arith.addf %57, %59 : vector<8x16xf32>
    %61 = math.tanh %60 : vector<8x16xf32>
    %cst_16 = arith.constant 1.000000e+00 : f32
    %62 = vector.broadcast %cst_16 : f32 to vector<8x16xf32>
    %63 = arith.subf %62, %56 : vector<8x16xf32>
    %64 = arith.mulf %63, %61 : vector<8x16xf32>
    %65 = vector.extract_strided_slice %8 {offsets = [0, 16], sizes = [8, 16], strides = [1, 1]} : vector<8x32xf32> to vector<8x16xf32>
    %66 = arith.mulf %56, %65 : vector<8x16xf32>
    %67 = arith.addf %64, %66 : vector<8x16xf32>
    %c0_17 = arith.constant 0 : index
    %c0_18 = arith.constant 0 : index
    %68 = vector.load %arg8[%c0_17, %c0_18] : memref<64x32xf32, #tpu.memory_space<vmem>>, vector<8x16xf32>
    tpu.vector_store %arg8[%c0_17, %c0_18], %40 {strides = array<i32>} : memref<64x32xf32, #tpu.memory_space<vmem>>, vector<8x16xf32>,
    %c56 = arith.constant 56 : index
    %c16 = arith.constant 16 : index
    %69 = vector.load %arg8[%c56, %c16] : memref<64x32xf32, #tpu.memory_space<vmem>>, vector<8x16xf32>
    tpu.vector_store %arg8[%c56, %c16], %67 {strides = array<i32>} : memref<64x32xf32, #tpu.memory_space<vmem>>, vector<8x16xf32>,
    %70 = tpu.concatenate %40, %67 in 1 : vector<8x16xf32>, vector<8x16xf32> -> vector<8x32xf32>
    %71 = vector.extract_strided_slice %7 {offsets = [8, 0], sizes = [8, 48], strides = [1, 1]} : vector<64x96xf32> to vector<8x48xf32>
    %72 = vector.extract_strided_slice %7 {offsets = [48, 48], sizes = [8, 48], strides = [1, 1]} : vector<64x96xf32> to vector<8x48xf32>
    %cst_19 = arith.constant dense<0.000000e+00> : vector<8x96xf32>
    %73 = tpu.matmul %70, %2, %cst_19 {dimension_numbers = #tpu.dot_dimension_numbers<[1], [0], [0], [1], [0, 0, 1, 1], [], []>} : vector<8x32xf32>, vector<32x96xf32>, vector<8x96xf32> -> vector<8x96xf32>
    %74 = vector.broadcast %4 : vector<1x96xf32> to vector<8x96xf32>
    %75 = arith.addf %73, %74 : vector<8x96xf32>
    %76 = vector.extract_strided_slice %71 {offsets = [0, 0], sizes = [8, 16], strides = [1, 1]} : vector<8x48xf32> to vector<8x16xf32>
    %77 = vector.extract_strided_slice %75 {offsets = [0, 0], sizes = [8, 16], strides = [1, 1]} : vector<8x96xf32> to vector<8x16xf32>
    %78 = arith.addf %76, %77 : vector<8x16xf32>
    %79 = arith.negf %78 : vector<8x16xf32>
    %80 = math.exp %79 : vector<8x16xf32>
    %cst_20 = arith.constant 1.000000e+00 : f32
    %81 = vector.broadcast %cst_20 : f32 to vector<8x16xf32>
    %82 = arith.addf %81, %80 : vector<8x16xf32>
    %83 = arith.divf %81, %82 : vector<8x16xf32>
    %84 = vector.extract_strided_slice %71 {offsets = [0, 16], sizes = [8, 16], strides = [1, 1]} : vector<8x48xf32> to vector<8x16xf32>
    %85 = vector.extract_strided_slice %75 {offsets = [0, 16], sizes = [8, 16], strides = [1, 1]} : vector<8x96xf32> to vector<8x16xf32>
    %86 = arith.addf %84, %85 : vector<8x16xf32>
    %87 = arith.negf %86 : vector<8x16xf32>
    %88 = math.exp %87 : vector<8x16xf32>
    %cst_21 = arith.constant 1.000000e+00 : f32
    %89 = vector.broadcast %cst_21 : f32 to vector<8x16xf32>
    %90 = arith.addf %89, %88 : vector<8x16xf32>
    %91 = arith.divf %89, %90 : vector<8x16xf32>
    %92 = vector.extract_strided_slice %71 {offsets = [0, 32], sizes = [8, 16], strides = [1, 1]} : vector<8x48xf32> to vector<8x16xf32>
    %93 = vector.extract_strided_slice %75 {offsets = [0, 32], sizes = [8, 16], strides = [1, 1]} : vector<8x96xf32> to vector<8x16xf32>
    %94 = arith.mulf %83, %93 : vector<8x16xf32>
    %95 = arith.addf %92, %94 : vector<8x16xf32>
    %96 = math.tanh %95 : vector<8x16xf32>
    %cst_22 = arith.constant 1.000000e+00 : f32
    %97 = vector.broadcast %cst_22 : f32 to vector<8x16xf32>
    %98 = arith.subf %97, %91 : vector<8x16xf32>
    %99 = arith.mulf %98, %96 : vector<8x16xf32>
    %100 = vector.extract_strided_slice %70 {offsets = [0, 0], sizes = [8, 16], strides = [1, 1]} : vector<8x32xf32> to vector<8x16xf32>
    %101 = arith.mulf %91, %100 : vector<8x16xf32>
    %102 = arith.addf %99, %101 : vector<8x16xf32>
    %103 = vector.extract_strided_slice %72 {offsets = [0, 0], sizes = [8, 16], strides = [1, 1]} : vector<8x48xf32> to vector<8x16xf32>
    %104 = vector.extract_strided_slice %75 {offsets = [0, 48], sizes = [8, 16], strides = [1, 1]} : vector<8x96xf32> to vector<8x16xf32>
    %105 = arith.addf %103, %104 : vector<8x16xf32>
    %106 = arith.negf %105 : vector<8x16xf32>
    %107 = math.exp %106 : vector<8x16xf32>
    %cst_23 = arith.constant 1.000000e+00 : f32
    %108 = vector.broadcast %cst_23 : f32 to vector<8x16xf32>
    %109 = arith.addf %108, %107 : vector<8x16xf32>
    %110 = arith.divf %108, %109 : vector<8x16xf32>
    %111 = vector.extract_strided_slice %72 {offsets = [0, 16], sizes = [8, 16], strides = [1, 1]} : vector<8x48xf32> to vector<8x16xf32>
    %112 = vector.extract_strided_slice %75 {offsets = [0, 64], sizes = [8, 16], strides = [1, 1]} : vector<8x96xf32> to vector<8x16xf32>
    %113 = arith.addf %111, %112 : vector<8x16xf32>
    %114 = arith.negf %113 : vector<8x16xf32>
    %115 = math.exp %114 : vector<8x16xf32>
    %cst_24 = arith.constant 1.000000e+00 : f32
    %116 = vector.broadcast %cst_24 : f32 to vector<8x16xf32>
    %117 = arith.addf %116, %115 : vector<8x16xf32>
    %118 = arith.divf %116, %117 : vector<8x16xf32>
    %119 = vector.extract_strided_slice %72 {offsets = [0, 32], sizes = [8, 16], strides = [1, 1]} : vector<8x48xf32> to vector<8x16xf32>
    %120 = vector.extract_strided_slice %75 {offsets = [0, 80], sizes = [8, 16], strides = [1, 1]} : vector<8x96xf32> to vector<8x16xf32>
    %121 = arith.mulf %110, %120 : vector<8x16xf32>
    %122 = arith.addf %119, %121 : vector<8x16xf32>
    %123 = math.tanh %122 : vector<8x16xf32>
    %cst_25 = arith.constant 1.000000e+00 : f32
    %124 = vector.broadcast %cst_25 : f32 to vector<8x16xf32>
    %125 = arith.subf %124, %118 : vector<8x16xf32>
    %126 = arith.mulf %125, %123 : vector<8x16xf32>
    %127 = vector.extract_strided_slice %70 {offsets = [0, 16], sizes = [8, 16], strides = [1, 1]} : vector<8x32xf32> to vector<8x16xf32>
    %128 = arith.mulf %118, %127 : vector<8x16xf32>
    %129 = arith.addf %126, %128 : vector<8x16xf32>
    %c8 = arith.constant 8 : index
    %c0_26 = arith.constant 0 : index
    %130 = vector.load %arg8[%c8, %c0_26] : memref<64x32xf32, #tpu.memory_space<vmem>>, vector<8x16xf32>
    tpu.vector_store %arg8[%c8, %c0_26], %102 {strides = array<i32>} : memref<64x32xf32, #tpu.memory_space<vmem>>, vector<8x16xf32>,
    %c48 = arith.constant 48 : index
    %c16_27 = arith.constant 16 : index
    %131 = vector.load %arg8[%c48, %c16_27] : memref<64x32xf32, #tpu.memory_space<vmem>>, vector<8x16xf32>
    tpu.vector_store %arg8[%c48, %c16_27], %129 {strides = array<i32>} : memref<64x32xf32, #tpu.memory_space<vmem>>, vector<8x16xf32>,
    %132 = tpu.concatenate %102, %129 in 1 : vector<8x16xf32>, vector<8x16xf32> -> vector<8x32xf32>
    %133 = vector.extract_strided_slice %7 {offsets = [16, 0], sizes = [8, 48], strides = [1, 1]} : vector<64x96xf32> to vector<8x48xf32>
    %134 = vector.extract_strided_slice %7 {offsets = [40, 48], sizes = [8, 48], strides = [1, 1]} : vector<64x96xf32> to vector<8x48xf32>
    %cst_28 = arith.constant dense<0.000000e+00> : vector<8x96xf32>
    %135 = tpu.matmul %132, %2, %cst_28 {dimension_numbers = #tpu.dot_dimension_numbers<[1], [0], [0], [1], [0, 0, 1, 1], [], []>} : vector<8x32xf32>, vector<32x96xf32>, vector<8x96xf32> -> vector<8x96xf32>
    %136 = vector.broadcast %4 : vector<1x96xf32> to vector<8x96xf32>
    %137 = arith.addf %135, %136 : vector<8x96xf32>
    %138 = vector.extract_strided_slice %133 {offsets = [0, 0], sizes = [8, 16], strides = [1, 1]} : vector<8x48xf32> to vector<8x16xf32>
    %139 = vector.extract_strided_slice %137 {offsets = [0, 0], sizes = [8, 16], strides = [1, 1]} : vector<8x96xf32> to vector<8x16xf32>
    %140 = arith.addf %138, %139 : vector<8x16xf32>
    %141 = arith.negf %140 : vector<8x16xf32>
    %142 = math.exp %141 : vector<8x16xf32>
    %cst_29 = arith.constant 1.000000e+00 : f32
    %143 = vector.broadcast %cst_29 : f32 to vector<8x16xf32>
    %144 = arith.addf %143, %142 : vector<8x16xf32>
    %145 = arith.divf %143, %144 : vector<8x16xf32>
    %146 = vector.extract_strided_slice %133 {offsets = [0, 16], sizes = [8, 16], strides = [1, 1]} : vector<8x48xf32> to vector<8x16xf32>
    %147 = vector.extract_strided_slice %137 {offsets = [0, 16], sizes = [8, 16], strides = [1, 1]} : vector<8x96xf32> to vector<8x16xf32>
    %148 = arith.addf %146, %147 : vector<8x16xf32>
    %149 = arith.negf %148 : vector<8x16xf32>
    %150 = math.exp %149 : vector<8x16xf32>
    %cst_30 = arith.constant 1.000000e+00 : f32
    %151 = vector.broadcast %cst_30 : f32 to vector<8x16xf32>
    %152 = arith.addf %151, %150 : vector<8x16xf32>
    %153 = arith.divf %151, %152 : vector<8x16xf32>
    %154 = vector.extract_strided_slice %133 {offsets = [0, 32], sizes = [8, 16], strides = [1, 1]} : vector<8x48xf32> to vector<8x16xf32>
    %155 = vector.extract_strided_slice %137 {offsets = [0, 32], sizes = [8, 16], strides = [1, 1]} : vector<8x96xf32> to vector<8x16xf32>
    %156 = arith.mulf %145, %155 : vector<8x16xf32>
    %157 = arith.addf %154, %156 : vector<8x16xf32>
    %158 = math.tanh %157 : vector<8x16xf32>
    %cst_31 = arith.constant 1.000000e+00 : f32
    %159 = vector.broadcast %cst_31 : f32 to vector<8x16xf32>
    %160 = arith.subf %159, %153 : vector<8x16xf32>
    %161 = arith.mulf %160, %158 : vector<8x16xf32>
    %162 = vector.extract_strided_slice %132 {offsets = [0, 0], sizes = [8, 16], strides = [1, 1]} : vector<8x32xf32> to vector<8x16xf32>
    %163 = arith.mulf %153, %162 : vector<8x16xf32>
    %164 = arith.addf %161, %163 : vector<8x16xf32>
    %165 = vector.extract_strided_slice %134 {offsets = [0, 0], sizes = [8, 16], strides = [1, 1]} : vector<8x48xf32> to vector<8x16xf32>
    %166 = vector.extract_strided_slice %137 {offsets = [0, 48], sizes = [8, 16], strides = [1, 1]} : vector<8x96xf32> to vector<8x16xf32>
    %167 = arith.addf %165, %166 : vector<8x16xf32>
    %168 = arith.negf %167 : vector<8x16xf32>
    %169 = math.exp %168 : vector<8x16xf32>
    %cst_32 = arith.constant 1.000000e+00 : f32
    %170 = vector.broadcast %cst_32 : f32 to vector<8x16xf32>
    %171 = arith.addf %170, %169 : vector<8x16xf32>
    %172 = arith.divf %170, %171 : vector<8x16xf32>
    %173 = vector.extract_strided_slice %134 {offsets = [0, 16], sizes = [8, 16], strides = [1, 1]} : vector<8x48xf32> to vector<8x16xf32>
    %174 = vector.extract_strided_slice %137 {offsets = [0, 64], sizes = [8, 16], strides = [1, 1]} : vector<8x96xf32> to vector<8x16xf32>
    %175 = arith.addf %173, %174 : vector<8x16xf32>
    %176 = arith.negf %175 : vector<8x16xf32>
    %177 = math.exp %176 : vector<8x16xf32>
    %cst_33 = arith.constant 1.000000e+00 : f32
    %178 = vector.broadcast %cst_33 : f32 to vector<8x16xf32>
    %179 = arith.addf %178, %177 : vector<8x16xf32>
    %180 = arith.divf %178, %179 : vector<8x16xf32>
    %181 = vector.extract_strided_slice %134 {offsets = [0, 32], sizes = [8, 16], strides = [1, 1]} : vector<8x48xf32> to vector<8x16xf32>
    %182 = vector.extract_strided_slice %137 {offsets = [0, 80], sizes = [8, 16], strides = [1, 1]} : vector<8x96xf32> to vector<8x16xf32>
    %183 = arith.mulf %172, %182 : vector<8x16xf32>
    %184 = arith.addf %181, %183 : vector<8x16xf32>
    %185 = math.tanh %184 : vector<8x16xf32>
    %cst_34 = arith.constant 1.000000e+00 : f32
    %186 = vector.broadcast %cst_34 : f32 to vector<8x16xf32>
    %187 = arith.subf %186, %180 : vector<8x16xf32>
    %188 = arith.mulf %187, %185 : vector<8x16xf32>
    %189 = vector.extract_strided_slice %132 {offsets = [0, 16], sizes = [8, 16], strides = [1, 1]} : vector<8x32xf32> to vector<8x16xf32>
    %190 = arith.mulf %180, %189 : vector<8x16xf32>
    %191 = arith.addf %188, %190 : vector<8x16xf32>
    %c16_35 = arith.constant 16 : index
    %c0_36 = arith.constant 0 : index
    %192 = vector.load %arg8[%c16_35, %c0_36] : memref<64x32xf32, #tpu.memory_space<vmem>>, vector<8x16xf32>
    tpu.vector_store %arg8[%c16_35, %c0_36], %164 {strides = array<i32>} : memref<64x32xf32, #tpu.memory_space<vmem>>, vector<8x16xf32>,
    %c40 = arith.constant 40 : index
    %c16_37 = arith.constant 16 : index
    %193 = vector.load %arg8[%c40, %c16_37] : memref<64x32xf32, #tpu.memory_space<vmem>>, vector<8x16xf32>
    tpu.vector_store %arg8[%c40, %c16_37], %191 {strides = array<i32>} : memref<64x32xf32, #tpu.memory_space<vmem>>, vector<8x16xf32>,
    %194 = tpu.concatenate %164, %191 in 1 : vector<8x16xf32>, vector<8x16xf32> -> vector<8x32xf32>
    %195 = vector.extract_strided_slice %7 {offsets = [24, 0], sizes = [8, 48], strides = [1, 1]} : vector<64x96xf32> to vector<8x48xf32>
    %196 = vector.extract_strided_slice %7 {offsets = [32, 48], sizes = [8, 48], strides = [1, 1]} : vector<64x96xf32> to vector<8x48xf32>
    %cst_38 = arith.constant dense<0.000000e+00> : vector<8x96xf32>
    %197 = tpu.matmul %194, %2, %cst_38 {dimension_numbers = #tpu.dot_dimension_numbers<[1], [0], [0], [1], [0, 0, 1, 1], [], []>} : vector<8x32xf32>, vector<32x96xf32>, vector<8x96xf32> -> vector<8x96xf32>
    %198 = vector.broadcast %4 : vector<1x96xf32> to vector<8x96xf32>
    %199 = arith.addf %197, %198 : vector<8x96xf32>
    %200 = vector.extract_strided_slice %195 {offsets = [0, 0], sizes = [8, 16], strides = [1, 1]} : vector<8x48xf32> to vector<8x16xf32>
    %201 = vector.extract_strided_slice %199 {offsets = [0, 0], sizes = [8, 16], strides = [1, 1]} : vector<8x96xf32> to vector<8x16xf32>
    %202 = arith.addf %200, %201 : vector<8x16xf32>
    %203 = arith.negf %202 : vector<8x16xf32>
    %204 = math.exp %203 : vector<8x16xf32>
    %cst_39 = arith.constant 1.000000e+00 : f32
    %205 = vector.broadcast %cst_39 : f32 to vector<8x16xf32>
    %206 = arith.addf %205, %204 : vector<8x16xf32>
    %207 = arith.divf %205, %206 : vector<8x16xf32>
    %208 = vector.extract_strided_slice %195 {offsets = [0, 16], sizes = [8, 16], strides = [1, 1]} : vector<8x48xf32> to vector<8x16xf32>
    %209 = vector.extract_strided_slice %199 {offsets = [0, 16], sizes = [8, 16], strides = [1, 1]} : vector<8x96xf32> to vector<8x16xf32>
    %210 = arith.addf %208, %209 : vector<8x16xf32>
    %211 = arith.negf %210 : vector<8x16xf32>
    %212 = math.exp %211 : vector<8x16xf32>
    %cst_40 = arith.constant 1.000000e+00 : f32
    %213 = vector.broadcast %cst_40 : f32 to vector<8x16xf32>
    %214 = arith.addf %213, %212 : vector<8x16xf32>
    %215 = arith.divf %213, %214 : vector<8x16xf32>
    %216 = vector.extract_strided_slice %195 {offsets = [0, 32], sizes = [8, 16], strides = [1, 1]} : vector<8x48xf32> to vector<8x16xf32>
    %217 = vector.extract_strided_slice %199 {offsets = [0, 32], sizes = [8, 16], strides = [1, 1]} : vector<8x96xf32> to vector<8x16xf32>
    %218 = arith.mulf %207, %217 : vector<8x16xf32>
    %219 = arith.addf %216, %218 : vector<8x16xf32>
    %220 = math.tanh %219 : vector<8x16xf32>
    %cst_41 = arith.constant 1.000000e+00 : f32
    %221 = vector.broadcast %cst_41 : f32 to vector<8x16xf32>
    %222 = arith.subf %221, %215 : vector<8x16xf32>
    %223 = arith.mulf %222, %220 : vector<8x16xf32>
    %224 = vector.extract_strided_slice %194 {offsets = [0, 0], sizes = [8, 16], strides = [1, 1]} : vector<8x32xf32> to vector<8x16xf32>
    %225 = arith.mulf %215, %224 : vector<8x16xf32>
    %226 = arith.addf %223, %225 : vector<8x16xf32>
    %227 = vector.extract_strided_slice %196 {offsets = [0, 0], sizes = [8, 16], strides = [1, 1]} : vector<8x48xf32> to vector<8x16xf32>
    %228 = vector.extract_strided_slice %199 {offsets = [0, 48], sizes = [8, 16], strides = [1, 1]} : vector<8x96xf32> to vector<8x16xf32>
    %229 = arith.addf %227, %228 : vector<8x16xf32>
    %230 = arith.negf %229 : vector<8x16xf32>
    %231 = math.exp %230 : vector<8x16xf32>
    %cst_42 = arith.constant 1.000000e+00 : f32
    %232 = vector.broadcast %cst_42 : f32 to vector<8x16xf32>
    %233 = arith.addf %232, %231 : vector<8x16xf32>
    %234 = arith.divf %232, %233 : vector<8x16xf32>
    %235 = vector.extract_strided_slice %196 {offsets = [0, 16], sizes = [8, 16], strides = [1, 1]} : vector<8x48xf32> to vector<8x16xf32>
    %236 = vector.extract_strided_slice %199 {offsets = [0, 64], sizes = [8, 16], strides = [1, 1]} : vector<8x96xf32> to vector<8x16xf32>
    %237 = arith.addf %235, %236 : vector<8x16xf32>
    %238 = arith.negf %237 : vector<8x16xf32>
    %239 = math.exp %238 : vector<8x16xf32>
    %cst_43 = arith.constant 1.000000e+00 : f32
    %240 = vector.broadcast %cst_43 : f32 to vector<8x16xf32>
    %241 = arith.addf %240, %239 : vector<8x16xf32>
    %242 = arith.divf %240, %241 : vector<8x16xf32>
    %243 = vector.extract_strided_slice %196 {offsets = [0, 32], sizes = [8, 16], strides = [1, 1]} : vector<8x48xf32> to vector<8x16xf32>
    %244 = vector.extract_strided_slice %199 {offsets = [0, 80], sizes = [8, 16], strides = [1, 1]} : vector<8x96xf32> to vector<8x16xf32>
    %245 = arith.mulf %234, %244 : vector<8x16xf32>
    %246 = arith.addf %243, %245 : vector<8x16xf32>
    %247 = math.tanh %246 : vector<8x16xf32>
    %cst_44 = arith.constant 1.000000e+00 : f32
    %248 = vector.broadcast %cst_44 : f32 to vector<8x16xf32>
    %249 = arith.subf %248, %242 : vector<8x16xf32>
    %250 = arith.mulf %249, %247 : vector<8x16xf32>
    %251 = vector.extract_strided_slice %194 {offsets = [0, 16], sizes = [8, 16], strides = [1, 1]} : vector<8x32xf32> to vector<8x16xf32>
    %252 = arith.mulf %242, %251 : vector<8x16xf32>
    %253 = arith.addf %250, %252 : vector<8x16xf32>
    %c24 = arith.constant 24 : index
    %c0_45 = arith.constant 0 : index
    %254 = vector.load %arg8[%c24, %c0_45] : memref<64x32xf32, #tpu.memory_space<vmem>>, vector<8x16xf32>
    tpu.vector_store %arg8[%c24, %c0_45], %226 {strides = array<i32>} : memref<64x32xf32, #tpu.memory_space<vmem>>, vector<8x16xf32>,
    %c32 = arith.constant 32 : index
    %c16_46 = arith.constant 16 : index
    %255 = vector.load %arg8[%c32, %c16_46] : memref<64x32xf32, #tpu.memory_space<vmem>>, vector<8x16xf32>
    tpu.vector_store %arg8[%c32, %c16_46], %253 {strides = array<i32>} : memref<64x32xf32, #tpu.memory_space<vmem>>, vector<8x16xf32>,
    %256 = tpu.concatenate %226, %253 in 1 : vector<8x16xf32>, vector<8x16xf32> -> vector<8x32xf32>
    %257 = vector.extract_strided_slice %7 {offsets = [32, 0], sizes = [8, 48], strides = [1, 1]} : vector<64x96xf32> to vector<8x48xf32>
    %258 = vector.extract_strided_slice %7 {offsets = [24, 48], sizes = [8, 48], strides = [1, 1]} : vector<64x96xf32> to vector<8x48xf32>
    %cst_47 = arith.constant dense<0.000000e+00> : vector<8x96xf32>
    %259 = tpu.matmul %256, %2, %cst_47 {dimension_numbers = #tpu.dot_dimension_numbers<[1], [0], [0], [1], [0, 0, 1, 1], [], []>} : vector<8x32xf32>, vector<32x96xf32>, vector<8x96xf32> -> vector<8x96xf32>
    %260 = vector.broadcast %4 : vector<1x96xf32> to vector<8x96xf32>
    %261 = arith.addf %259, %260 : vector<8x96xf32>
    %262 = vector.extract_strided_slice %257 {offsets = [0, 0], sizes = [8, 16], strides = [1, 1]} : vector<8x48xf32> to vector<8x16xf32>
    %263 = vector.extract_strided_slice %261 {offsets = [0, 0], sizes = [8, 16], strides = [1, 1]} : vector<8x96xf32> to vector<8x16xf32>
    %264 = arith.addf %262, %263 : vector<8x16xf32>
    %265 = arith.negf %264 : vector<8x16xf32>
    %266 = math.exp %265 : vector<8x16xf32>
    %cst_48 = arith.constant 1.000000e+00 : f32
    %267 = vector.broadcast %cst_48 : f32 to vector<8x16xf32>
    %268 = arith.addf %267, %266 : vector<8x16xf32>
    %269 = arith.divf %267, %268 : vector<8x16xf32>
    %270 = vector.extract_strided_slice %257 {offsets = [0, 16], sizes = [8, 16], strides = [1, 1]} : vector<8x48xf32> to vector<8x16xf32>
    %271 = vector.extract_strided_slice %261 {offsets = [0, 16], sizes = [8, 16], strides = [1, 1]} : vector<8x96xf32> to vector<8x16xf32>
    %272 = arith.addf %270, %271 : vector<8x16xf32>
    %273 = arith.negf %272 : vector<8x16xf32>
    %274 = math.exp %273 : vector<8x16xf32>
    %cst_49 = arith.constant 1.000000e+00 : f32
    %275 = vector.broadcast %cst_49 : f32 to vector<8x16xf32>
    %276 = arith.addf %275, %274 : vector<8x16xf32>
    %277 = arith.divf %275, %276 : vector<8x16xf32>
    %278 = vector.extract_strided_slice %257 {offsets = [0, 32], sizes = [8, 16], strides = [1, 1]} : vector<8x48xf32> to vector<8x16xf32>
    %279 = vector.extract_strided_slice %261 {offsets = [0, 32], sizes = [8, 16], strides = [1, 1]} : vector<8x96xf32> to vector<8x16xf32>
    %280 = arith.mulf %269, %279 : vector<8x16xf32>
    %281 = arith.addf %278, %280 : vector<8x16xf32>
    %282 = math.tanh %281 : vector<8x16xf32>
    %cst_50 = arith.constant 1.000000e+00 : f32
    %283 = vector.broadcast %cst_50 : f32 to vector<8x16xf32>
    %284 = arith.subf %283, %277 : vector<8x16xf32>
    %285 = arith.mulf %284, %282 : vector<8x16xf32>
    %286 = vector.extract_strided_slice %256 {offsets = [0, 0], sizes = [8, 16], strides = [1, 1]} : vector<8x32xf32> to vector<8x16xf32>
    %287 = arith.mulf %277, %286 : vector<8x16xf32>
    %288 = arith.addf %285, %287 : vector<8x16xf32>
    %289 = vector.extract_strided_slice %258 {offsets = [0, 0], sizes = [8, 16], strides = [1, 1]} : vector<8x48xf32> to vector<8x16xf32>
    %290 = vector.extract_strided_slice %261 {offsets = [0, 48], sizes = [8, 16], strides = [1, 1]} : vector<8x96xf32> to vector<8x16xf32>
    %291 = arith.addf %289, %290 : vector<8x16xf32>
    %292 = arith.negf %291 : vector<8x16xf32>
    %293 = math.exp %292 : vector<8x16xf32>
    %cst_51 = arith.constant 1.000000e+00 : f32
    %294 = vector.broadcast %cst_51 : f32 to vector<8x16xf32>
    %295 = arith.addf %294, %293 : vector<8x16xf32>
    %296 = arith.divf %294, %295 : vector<8x16xf32>
    %297 = vector.extract_strided_slice %258 {offsets = [0, 16], sizes = [8, 16], strides = [1, 1]} : vector<8x48xf32> to vector<8x16xf32>
    %298 = vector.extract_strided_slice %261 {offsets = [0, 64], sizes = [8, 16], strides = [1, 1]} : vector<8x96xf32> to vector<8x16xf32>
    %299 = arith.addf %297, %298 : vector<8x16xf32>
    %300 = arith.negf %299 : vector<8x16xf32>
    %301 = math.exp %300 : vector<8x16xf32>
    %cst_52 = arith.constant 1.000000e+00 : f32
    %302 = vector.broadcast %cst_52 : f32 to vector<8x16xf32>
    %303 = arith.addf %302, %301 : vector<8x16xf32>
    %304 = arith.divf %302, %303 : vector<8x16xf32>
    %305 = vector.extract_strided_slice %258 {offsets = [0, 32], sizes = [8, 16], strides = [1, 1]} : vector<8x48xf32> to vector<8x16xf32>
    %306 = vector.extract_strided_slice %261 {offsets = [0, 80], sizes = [8, 16], strides = [1, 1]} : vector<8x96xf32> to vector<8x16xf32>
    %307 = arith.mulf %296, %306 : vector<8x16xf32>
    %308 = arith.addf %305, %307 : vector<8x16xf32>
    %309 = math.tanh %308 : vector<8x16xf32>
    %cst_53 = arith.constant 1.000000e+00 : f32
    %310 = vector.broadcast %cst_53 : f32 to vector<8x16xf32>
    %311 = arith.subf %310, %304 : vector<8x16xf32>
    %312 = arith.mulf %311, %309 : vector<8x16xf32>
    %313 = vector.extract_strided_slice %256 {offsets = [0, 16], sizes = [8, 16], strides = [1, 1]} : vector<8x32xf32> to vector<8x16xf32>
    %314 = arith.mulf %304, %313 : vector<8x16xf32>
    %315 = arith.addf %312, %314 : vector<8x16xf32>
    %c32_54 = arith.constant 32 : index
    %c0_55 = arith.constant 0 : index
    %316 = vector.load %arg8[%c32_54, %c0_55] : memref<64x32xf32, #tpu.memory_space<vmem>>, vector<8x16xf32>
    tpu.vector_store %arg8[%c32_54, %c0_55], %288 {strides = array<i32>} : memref<64x32xf32, #tpu.memory_space<vmem>>, vector<8x16xf32>,
    %c24_56 = arith.constant 24 : index
    %c16_57 = arith.constant 16 : index
    %317 = vector.load %arg8[%c24_56, %c16_57] : memref<64x32xf32, #tpu.memory_space<vmem>>, vector<8x16xf32>
    tpu.vector_store %arg8[%c24_56, %c16_57], %315 {strides = array<i32>} : memref<64x32xf32, #tpu.memory_space<vmem>>, vector<8x16xf32>,
    %318 = tpu.concatenate %288, %315 in 1 : vector<8x16xf32>, vector<8x16xf32> -> vector<8x32xf32>
    %319 = vector.extract_strided_slice %7 {offsets = [40, 0], sizes = [8, 48], strides = [1, 1]} : vector<64x96xf32> to vector<8x48xf32>
    %320 = vector.extract_strided_slice %7 {offsets = [16, 48], sizes = [8, 48], strides = [1, 1]} : vector<64x96xf32> to vector<8x48xf32>
    %cst_58 = arith.constant dense<0.000000e+00> : vector<8x96xf32>
    %321 = tpu.matmul %318, %2, %cst_58 {dimension_numbers = #tpu.dot_dimension_numbers<[1], [0], [0], [1], [0, 0, 1, 1], [], []>} : vector<8x32xf32>, vector<32x96xf32>, vector<8x96xf32> -> vector<8x96xf32>
    %322 = vector.broadcast %4 : vector<1x96xf32> to vector<8x96xf32>
    %323 = arith.addf %321, %322 : vector<8x96xf32>
    %324 = vector.extract_strided_slice %319 {offsets = [0, 0], sizes = [8, 16], strides = [1, 1]} : vector<8x48xf32> to vector<8x16xf32>
    %325 = vector.extract_strided_slice %323 {offsets = [0, 0], sizes = [8, 16], strides = [1, 1]} : vector<8x96xf32> to vector<8x16xf32>
    %326 = arith.addf %324, %325 : vector<8x16xf32>
    %327 = arith.negf %326 : vector<8x16xf32>
    %328 = math.exp %327 : vector<8x16xf32>
    %cst_59 = arith.constant 1.000000e+00 : f32
    %329 = vector.broadcast %cst_59 : f32 to vector<8x16xf32>
    %330 = arith.addf %329, %328 : vector<8x16xf32>
    %331 = arith.divf %329, %330 : vector<8x16xf32>
    %332 = vector.extract_strided_slice %319 {offsets = [0, 16], sizes = [8, 16], strides = [1, 1]} : vector<8x48xf32> to vector<8x16xf32>
    %333 = vector.extract_strided_slice %323 {offsets = [0, 16], sizes = [8, 16], strides = [1, 1]} : vector<8x96xf32> to vector<8x16xf32>
    %334 = arith.addf %332, %333 : vector<8x16xf32>
    %335 = arith.negf %334 : vector<8x16xf32>
    %336 = math.exp %335 : vector<8x16xf32>
    %cst_60 = arith.constant 1.000000e+00 : f32
    %337 = vector.broadcast %cst_60 : f32 to vector<8x16xf32>
    %338 = arith.addf %337, %336 : vector<8x16xf32>
    %339 = arith.divf %337, %338 : vector<8x16xf32>
    %340 = vector.extract_strided_slice %319 {offsets = [0, 32], sizes = [8, 16], strides = [1, 1]} : vector<8x48xf32> to vector<8x16xf32>
    %341 = vector.extract_strided_slice %323 {offsets = [0, 32], sizes = [8, 16], strides = [1, 1]} : vector<8x96xf32> to vector<8x16xf32>
    %342 = arith.mulf %331, %341 : vector<8x16xf32>
    %343 = arith.addf %340, %342 : vector<8x16xf32>
    %344 = math.tanh %343 : vector<8x16xf32>
    %cst_61 = arith.constant 1.000000e+00 : f32
    %345 = vector.broadcast %cst_61 : f32 to vector<8x16xf32>
    %346 = arith.subf %345, %339 : vector<8x16xf32>
    %347 = arith.mulf %346, %344 : vector<8x16xf32>
    %348 = vector.extract_strided_slice %318 {offsets = [0, 0], sizes = [8, 16], strides = [1, 1]} : vector<8x32xf32> to vector<8x16xf32>
    %349 = arith.mulf %339, %348 : vector<8x16xf32>
    %350 = arith.addf %347, %349 : vector<8x16xf32>
    %351 = vector.extract_strided_slice %320 {offsets = [0, 0], sizes = [8, 16], strides = [1, 1]} : vector<8x48xf32> to vector<8x16xf32>
    %352 = vector.extract_strided_slice %323 {offsets = [0, 48], sizes = [8, 16], strides = [1, 1]} : vector<8x96xf32> to vector<8x16xf32>
    %353 = arith.addf %351, %352 : vector<8x16xf32>
    %354 = arith.negf %353 : vector<8x16xf32>
    %355 = math.exp %354 : vector<8x16xf32>
    %cst_62 = arith.constant 1.000000e+00 : f32
    %356 = vector.broadcast %cst_62 : f32 to vector<8x16xf32>
    %357 = arith.addf %356, %355 : vector<8x16xf32>
    %358 = arith.divf %356, %357 : vector<8x16xf32>
    %359 = vector.extract_strided_slice %320 {offsets = [0, 16], sizes = [8, 16], strides = [1, 1]} : vector<8x48xf32> to vector<8x16xf32>
    %360 = vector.extract_strided_slice %323 {offsets = [0, 64], sizes = [8, 16], strides = [1, 1]} : vector<8x96xf32> to vector<8x16xf32>
    %361 = arith.addf %359, %360 : vector<8x16xf32>
    %362 = arith.negf %361 : vector<8x16xf32>
    %363 = math.exp %362 : vector<8x16xf32>
    %cst_63 = arith.constant 1.000000e+00 : f32
    %364 = vector.broadcast %cst_63 : f32 to vector<8x16xf32>
    %365 = arith.addf %364, %363 : vector<8x16xf32>
    %366 = arith.divf %364, %365 : vector<8x16xf32>
    %367 = vector.extract_strided_slice %320 {offsets = [0, 32], sizes = [8, 16], strides = [1, 1]} : vector<8x48xf32> to vector<8x16xf32>
    %368 = vector.extract_strided_slice %323 {offsets = [0, 80], sizes = [8, 16], strides = [1, 1]} : vector<8x96xf32> to vector<8x16xf32>
    %369 = arith.mulf %358, %368 : vector<8x16xf32>
    %370 = arith.addf %367, %369 : vector<8x16xf32>
    %371 = math.tanh %370 : vector<8x16xf32>
    %cst_64 = arith.constant 1.000000e+00 : f32
    %372 = vector.broadcast %cst_64 : f32 to vector<8x16xf32>
    %373 = arith.subf %372, %366 : vector<8x16xf32>
    %374 = arith.mulf %373, %371 : vector<8x16xf32>
    %375 = vector.extract_strided_slice %318 {offsets = [0, 16], sizes = [8, 16], strides = [1, 1]} : vector<8x32xf32> to vector<8x16xf32>
    %376 = arith.mulf %366, %375 : vector<8x16xf32>
    %377 = arith.addf %374, %376 : vector<8x16xf32>
    %c40_65 = arith.constant 40 : index
    %c0_66 = arith.constant 0 : index
    %378 = vector.load %arg8[%c40_65, %c0_66] : memref<64x32xf32, #tpu.memory_space<vmem>>, vector<8x16xf32>
    tpu.vector_store %arg8[%c40_65, %c0_66], %350 {strides = array<i32>} : memref<64x32xf32, #tpu.memory_space<vmem>>, vector<8x16xf32>,
    %c16_67 = arith.constant 16 : index
    %c16_68 = arith.constant 16 : index
    %379 = vector.load %arg8[%c16_67, %c16_68] : memref<64x32xf32, #tpu.memory_space<vmem>>, vector<8x16xf32>
    tpu.vector_store %arg8[%c16_67, %c16_68], %377 {strides = array<i32>} : memref<64x32xf32, #tpu.memory_space<vmem>>, vector<8x16xf32>,
    %380 = tpu.concatenate %350, %377 in 1 : vector<8x16xf32>, vector<8x16xf32> -> vector<8x32xf32>
    %381 = vector.extract_strided_slice %7 {offsets = [48, 0], sizes = [8, 48], strides = [1, 1]} : vector<64x96xf32> to vector<8x48xf32>
    %382 = vector.extract_strided_slice %7 {offsets = [8, 48], sizes = [8, 48], strides = [1, 1]} : vector<64x96xf32> to vector<8x48xf32>
    %cst_69 = arith.constant dense<0.000000e+00> : vector<8x96xf32>
    %383 = tpu.matmul %380, %2, %cst_69 {dimension_numbers = #tpu.dot_dimension_numbers<[1], [0], [0], [1], [0, 0, 1, 1], [], []>} : vector<8x32xf32>, vector<32x96xf32>, vector<8x96xf32> -> vector<8x96xf32>
    %384 = vector.broadcast %4 : vector<1x96xf32> to vector<8x96xf32>
    %385 = arith.addf %383, %384 : vector<8x96xf32>
    %386 = vector.extract_strided_slice %381 {offsets = [0, 0], sizes = [8, 16], strides = [1, 1]} : vector<8x48xf32> to vector<8x16xf32>
    %387 = vector.extract_strided_slice %385 {offsets = [0, 0], sizes = [8, 16], strides = [1, 1]} : vector<8x96xf32> to vector<8x16xf32>
    %388 = arith.addf %386, %387 : vector<8x16xf32>
    %389 = arith.negf %388 : vector<8x16xf32>
    %390 = math.exp %389 : vector<8x16xf32>
    %cst_70 = arith.constant 1.000000e+00 : f32
    %391 = vector.broadcast %cst_70 : f32 to vector<8x16xf32>
    %392 = arith.addf %391, %390 : vector<8x16xf32>
    %393 = arith.divf %391, %392 : vector<8x16xf32>
    %394 = vector.extract_strided_slice %381 {offsets = [0, 16], sizes = [8, 16], strides = [1, 1]} : vector<8x48xf32> to vector<8x16xf32>
    %395 = vector.extract_strided_slice %385 {offsets = [0, 16], sizes = [8, 16], strides = [1, 1]} : vector<8x96xf32> to vector<8x16xf32>
    %396 = arith.addf %394, %395 : vector<8x16xf32>
    %397 = arith.negf %396 : vector<8x16xf32>
    %398 = math.exp %397 : vector<8x16xf32>
    %cst_71 = arith.constant 1.000000e+00 : f32
    %399 = vector.broadcast %cst_71 : f32 to vector<8x16xf32>
    %400 = arith.addf %399, %398 : vector<8x16xf32>
    %401 = arith.divf %399, %400 : vector<8x16xf32>
    %402 = vector.extract_strided_slice %381 {offsets = [0, 32], sizes = [8, 16], strides = [1, 1]} : vector<8x48xf32> to vector<8x16xf32>
    %403 = vector.extract_strided_slice %385 {offsets = [0, 32], sizes = [8, 16], strides = [1, 1]} : vector<8x96xf32> to vector<8x16xf32>
    %404 = arith.mulf %393, %403 : vector<8x16xf32>
    %405 = arith.addf %402, %404 : vector<8x16xf32>
    %406 = math.tanh %405 : vector<8x16xf32>
    %cst_72 = arith.constant 1.000000e+00 : f32
    %407 = vector.broadcast %cst_72 : f32 to vector<8x16xf32>
    %408 = arith.subf %407, %401 : vector<8x16xf32>
    %409 = arith.mulf %408, %406 : vector<8x16xf32>
    %410 = vector.extract_strided_slice %380 {offsets = [0, 0], sizes = [8, 16], strides = [1, 1]} : vector<8x32xf32> to vector<8x16xf32>
    %411 = arith.mulf %401, %410 : vector<8x16xf32>
    %412 = arith.addf %409, %411 : vector<8x16xf32>
    %413 = vector.extract_strided_slice %382 {offsets = [0, 0], sizes = [8, 16], strides = [1, 1]} : vector<8x48xf32> to vector<8x16xf32>
    %414 = vector.extract_strided_slice %385 {offsets = [0, 48], sizes = [8, 16], strides = [1, 1]} : vector<8x96xf32> to vector<8x16xf32>
    %415 = arith.addf %413, %414 : vector<8x16xf32>
    %416 = arith.negf %415 : vector<8x16xf32>
    %417 = math.exp %416 : vector<8x16xf32>
    %cst_73 = arith.constant 1.000000e+00 : f32
    %418 = vector.broadcast %cst_73 : f32 to vector<8x16xf32>
    %419 = arith.addf %418, %417 : vector<8x16xf32>
    %420 = arith.divf %418, %419 : vector<8x16xf32>
    %421 = vector.extract_strided_slice %382 {offsets = [0, 16], sizes = [8, 16], strides = [1, 1]} : vector<8x48xf32> to vector<8x16xf32>
    %422 = vector.extract_strided_slice %385 {offsets = [0, 64], sizes = [8, 16], strides = [1, 1]} : vector<8x96xf32> to vector<8x16xf32>
    %423 = arith.addf %421, %422 : vector<8x16xf32>
    %424 = arith.negf %423 : vector<8x16xf32>
    %425 = math.exp %424 : vector<8x16xf32>
    %cst_74 = arith.constant 1.000000e+00 : f32
    %426 = vector.broadcast %cst_74 : f32 to vector<8x16xf32>
    %427 = arith.addf %426, %425 : vector<8x16xf32>
    %428 = arith.divf %426, %427 : vector<8x16xf32>
    %429 = vector.extract_strided_slice %382 {offsets = [0, 32], sizes = [8, 16], strides = [1, 1]} : vector<8x48xf32> to vector<8x16xf32>
    %430 = vector.extract_strided_slice %385 {offsets = [0, 80], sizes = [8, 16], strides = [1, 1]} : vector<8x96xf32> to vector<8x16xf32>
    %431 = arith.mulf %420, %430 : vector<8x16xf32>
    %432 = arith.addf %429, %431 : vector<8x16xf32>
    %433 = math.tanh %432 : vector<8x16xf32>
    %cst_75 = arith.constant 1.000000e+00 : f32
    %434 = vector.broadcast %cst_75 : f32 to vector<8x16xf32>
    %435 = arith.subf %434, %428 : vector<8x16xf32>
    %436 = arith.mulf %435, %433 : vector<8x16xf32>
    %437 = vector.extract_strided_slice %380 {offsets = [0, 16], sizes = [8, 16], strides = [1, 1]} : vector<8x32xf32> to vector<8x16xf32>
    %438 = arith.mulf %428, %437 : vector<8x16xf32>
    %439 = arith.addf %436, %438 : vector<8x16xf32>
    %c48_76 = arith.constant 48 : index
    %c0_77 = arith.constant 0 : index
    %440 = vector.load %arg8[%c48_76, %c0_77] : memref<64x32xf32, #tpu.memory_space<vmem>>, vector<8x16xf32>
    tpu.vector_store %arg8[%c48_76, %c0_77], %412 {strides = array<i32>} : memref<64x32xf32, #tpu.memory_space<vmem>>, vector<8x16xf32>,
    %c8_78 = arith.constant 8 : index
    %c16_79 = arith.constant 16 : index
    %441 = vector.load %arg8[%c8_78, %c16_79] : memref<64x32xf32, #tpu.memory_space<vmem>>, vector<8x16xf32>
    tpu.vector_store %arg8[%c8_78, %c16_79], %439 {strides = array<i32>} : memref<64x32xf32, #tpu.memory_space<vmem>>, vector<8x16xf32>,
    %442 = tpu.concatenate %412, %439 in 1 : vector<8x16xf32>, vector<8x16xf32> -> vector<8x32xf32>
    %443 = vector.extract_strided_slice %7 {offsets = [56, 0], sizes = [8, 48], strides = [1, 1]} : vector<64x96xf32> to vector<8x48xf32>
    %444 = vector.extract_strided_slice %7 {offsets = [0, 48], sizes = [8, 48], strides = [1, 1]} : vector<64x96xf32> to vector<8x48xf32>
    %cst_80 = arith.constant dense<0.000000e+00> : vector<8x96xf32>
    %445 = tpu.matmul %442, %2, %cst_80 {dimension_numbers = #tpu.dot_dimension_numbers<[1], [0], [0], [1], [0, 0, 1, 1], [], []>} : vector<8x32xf32>, vector<32x96xf32>, vector<8x96xf32> -> vector<8x96xf32>
    %446 = vector.broadcast %4 : vector<1x96xf32> to vector<8x96xf32>
    %447 = arith.addf %445, %446 : vector<8x96xf32>
    %448 = vector.extract_strided_slice %443 {offsets = [0, 0], sizes = [8, 16], strides = [1, 1]} : vector<8x48xf32> to vector<8x16xf32>
    %449 = vector.extract_strided_slice %447 {offsets = [0, 0], sizes = [8, 16], strides = [1, 1]} : vector<8x96xf32> to vector<8x16xf32>
    %450 = arith.addf %448, %449 : vector<8x16xf32>
    %451 = arith.negf %450 : vector<8x16xf32>
    %452 = math.exp %451 : vector<8x16xf32>
    %cst_81 = arith.constant 1.000000e+00 : f32
    %453 = vector.broadcast %cst_81 : f32 to vector<8x16xf32>
    %454 = arith.addf %453, %452 : vector<8x16xf32>
    %455 = arith.divf %453, %454 : vector<8x16xf32>
    %456 = vector.extract_strided_slice %443 {offsets = [0, 16], sizes = [8, 16], strides = [1, 1]} : vector<8x48xf32> to vector<8x16xf32>
    %457 = vector.extract_strided_slice %447 {offsets = [0, 16], sizes = [8, 16], strides = [1, 1]} : vector<8x96xf32> to vector<8x16xf32>
    %458 = arith.addf %456, %457 : vector<8x16xf32>
    %459 = arith.negf %458 : vector<8x16xf32>
    %460 = math.exp %459 : vector<8x16xf32>
    %cst_82 = arith.constant 1.000000e+00 : f32
    %461 = vector.broadcast %cst_82 : f32 to vector<8x16xf32>
    %462 = arith.addf %461, %460 : vector<8x16xf32>
    %463 = arith.divf %461, %462 : vector<8x16xf32>
    %464 = vector.extract_strided_slice %443 {offsets = [0, 32], sizes = [8, 16], strides = [1, 1]} : vector<8x48xf32> to vector<8x16xf32>
    %465 = vector.extract_strided_slice %447 {offsets = [0, 32], sizes = [8, 16], strides = [1, 1]} : vector<8x96xf32> to vector<8x16xf32>
    %466 = arith.mulf %455, %465 : vector<8x16xf32>
    %467 = arith.addf %464, %466 : vector<8x16xf32>
    %468 = math.tanh %467 : vector<8x16xf32>
    %cst_83 = arith.constant 1.000000e+00 : f32
    %469 = vector.broadcast %cst_83 : f32 to vector<8x16xf32>
    %470 = arith.subf %469, %463 : vector<8x16xf32>
    %471 = arith.mulf %470, %468 : vector<8x16xf32>
    %472 = vector.extract_strided_slice %442 {offsets = [0, 0], sizes = [8, 16], strides = [1, 1]} : vector<8x32xf32> to vector<8x16xf32>
    %473 = arith.mulf %463, %472 : vector<8x16xf32>
    %474 = arith.addf %471, %473 : vector<8x16xf32>
    %475 = vector.extract_strided_slice %444 {offsets = [0, 0], sizes = [8, 16], strides = [1, 1]} : vector<8x48xf32> to vector<8x16xf32>
    %476 = vector.extract_strided_slice %447 {offsets = [0, 48], sizes = [8, 16], strides = [1, 1]} : vector<8x96xf32> to vector<8x16xf32>
    %477 = arith.addf %475, %476 : vector<8x16xf32>
    %478 = arith.negf %477 : vector<8x16xf32>
    %479 = math.exp %478 : vector<8x16xf32>
    %cst_84 = arith.constant 1.000000e+00 : f32
    %480 = vector.broadcast %cst_84 : f32 to vector<8x16xf32>
    %481 = arith.addf %480, %479 : vector<8x16xf32>
    %482 = arith.divf %480, %481 : vector<8x16xf32>
    %483 = vector.extract_strided_slice %444 {offsets = [0, 16], sizes = [8, 16], strides = [1, 1]} : vector<8x48xf32> to vector<8x16xf32>
    %484 = vector.extract_strided_slice %447 {offsets = [0, 64], sizes = [8, 16], strides = [1, 1]} : vector<8x96xf32> to vector<8x16xf32>
    %485 = arith.addf %483, %484 : vector<8x16xf32>
    %486 = arith.negf %485 : vector<8x16xf32>
    %487 = math.exp %486 : vector<8x16xf32>
    %cst_85 = arith.constant 1.000000e+00 : f32
    %488 = vector.broadcast %cst_85 : f32 to vector<8x16xf32>
    %489 = arith.addf %488, %487 : vector<8x16xf32>
    %490 = arith.divf %488, %489 : vector<8x16xf32>
    %491 = vector.extract_strided_slice %444 {offsets = [0, 32], sizes = [8, 16], strides = [1, 1]} : vector<8x48xf32> to vector<8x16xf32>
    %492 = vector.extract_strided_slice %447 {offsets = [0, 80], sizes = [8, 16], strides = [1, 1]} : vector<8x96xf32> to vector<8x16xf32>
    %493 = arith.mulf %482, %492 : vector<8x16xf32>
    %494 = arith.addf %491, %493 : vector<8x16xf32>
    %495 = math.tanh %494 : vector<8x16xf32>
    %cst_86 = arith.constant 1.000000e+00 : f32
    %496 = vector.broadcast %cst_86 : f32 to vector<8x16xf32>
    %497 = arith.subf %496, %490 : vector<8x16xf32>
    %498 = arith.mulf %497, %495 : vector<8x16xf32>
    %499 = vector.extract_strided_slice %442 {offsets = [0, 16], sizes = [8, 16], strides = [1, 1]} : vector<8x32xf32> to vector<8x16xf32>
    %500 = arith.mulf %490, %499 : vector<8x16xf32>
    %501 = arith.addf %498, %500 : vector<8x16xf32>
    %c56_87 = arith.constant 56 : index
    %c0_88 = arith.constant 0 : index
    %502 = vector.load %arg8[%c56_87, %c0_88] : memref<64x32xf32, #tpu.memory_space<vmem>>, vector<8x16xf32>
    tpu.vector_store %arg8[%c56_87, %c0_88], %474 {strides = array<i32>} : memref<64x32xf32, #tpu.memory_space<vmem>>, vector<8x16xf32>,
    %c0_89 = arith.constant 0 : index
    %c16_90 = arith.constant 16 : index
    %503 = vector.load %arg8[%c0_89, %c16_90] : memref<64x32xf32, #tpu.memory_space<vmem>>, vector<8x16xf32>
    tpu.vector_store %arg8[%c0_89, %c16_90], %501 {strides = array<i32>} : memref<64x32xf32, #tpu.memory_space<vmem>>, vector<8x16xf32>,
    %504 = tpu.concatenate %474, %501 in 1 : vector<8x16xf32>, vector<8x16xf32> -> vector<8x32xf32>
    %c0_91 = arith.constant 0 : index
    %c0_92 = arith.constant 0 : index
    %505 = vector.load %arg6[%c0_91, %c0_92] : memref<32x32xf32, #tpu.memory_space<vmem>>, vector<32x32xf32>
    %cst_93 = arith.constant dense<0.000000e+00> : vector<8x32xf32>
    %506 = tpu.matmul %504, %505, %cst_93 {dimension_numbers = #tpu.dot_dimension_numbers<[1], [0], [0], [1], [0, 0, 1, 1], [], []>} : vector<8x32xf32>, vector<32x32xf32>, vector<8x32xf32> -> vector<8x32xf32>
    %c0_94 = arith.constant 0 : index
    %c0_95 = arith.constant 0 : index
    %507 = vector.load %arg7[%c0_94, %c0_95] : memref<1x32xf32, #tpu.memory_space<vmem>>, vector<1x32xf32>
    %508 = vector.broadcast %507 : vector<1x32xf32> to vector<8x32xf32>
    %509 = arith.addf %506, %508 : vector<8x32xf32>
    %510 = math.tanh %509 : vector<8x32xf32>
    %c0_96 = arith.constant 0 : index
    %c0_97 = arith.constant 0 : index
    %511 = vector.load %arg9[%c0_96, %c0_97] : memref<8x32xf32, #tpu.memory_space<vmem>>, vector<8x32xf32>
    tpu.vector_store %arg9[%c0_96, %c0_97], %510 {strides = array<i32>} : memref<8x32xf32, #tpu.memory_space<vmem>>, vector<8x32xf32>,
    return
  }
  func.func @transform_0(%arg0: i32) -> (i32, i32) {
    %c0_i32 = arith.constant 0 : i32
    %c0_i32_0 = arith.constant 0 : i32
    %c0_i32_1 = arith.constant 0 : i32
    return %c0_i32, %c0_i32_0 : i32, i32
  }
  func.func @transform_1(%arg0: i32) -> (i32, i32) {
    %c0_i32 = arith.constant 0 : i32
    %c0_i32_0 = arith.constant 0 : i32
    %c0_i32_1 = arith.constant 0 : i32
    return %c0_i32, %c0_i32_0 : i32, i32
  }
  func.func @transform_2(%arg0: i32) -> (i32, i32) {
    %c0_i32 = arith.constant 0 : i32
    %c0_i32_0 = arith.constant 0 : i32
    %c0_i32_1 = arith.constant 0 : i32
    return %c0_i32, %c0_i32_0 : i32, i32
  }
  func.func @transform_3(%arg0: i32) -> (i32, i32) {
    %c0_i32 = arith.constant 0 : i32
    %c0_i32_0 = arith.constant 0 : i32
    %c0_i32_1 = arith.constant 0 : i32
    return %c0_i32, %c0_i32_0 : i32, i32
  }
  func.func @transform_4(%arg0: i32) -> (i32, i32) {
    %c0_i32 = arith.constant 0 : i32
    %c0_i32_0 = arith.constant 0 : i32
    %c0_i32_1 = arith.constant 0 : i32
    return %c0_i32, %c0_i32_0 : i32, i32
  }
  func.func @transform_5(%arg0: i32) -> (i32, i32) {
    %c0_i32 = arith.constant 0 : i32
    %c0_i32_0 = arith.constant 0 : i32
    %c0_i32_1 = arith.constant 0 : i32
    return %c0_i32, %c0_i32_0 : i32, i32
  }
  func.func @transform_6(%arg0: i32) -> (i32, i32) {
    %c0_i32 = arith.constant 0 : i32
    %c0_i32_0 = arith.constant 0 : i32
    %c0_i32_1 = arith.constant 0 : i32
    return %c0_i32, %c0_i32_0 : i32, i32
  }
  func.func @transform_7(%arg0: i32) -> (i32, i32) {
    %c0_i32 = arith.constant 0 : i32
    %c0_i32_0 = arith.constant 0 : i32
    %c0_i32_1 = arith.constant 0 : i32
    return %c0_i32, %c0_i32_0 : i32, i32
  }
  func.func @transform_8(%arg0: i32) -> (i32, i32) {
    %c0_i32 = arith.constant 0 : i32
    %c0_i32_0 = arith.constant 0 : i32
    %c0_i32_1 = arith.constant 0 : i32
    return %c0_i32, %c0_i32_0 : i32, i32
  }
}

</mosaic_0001>

<bundles_post_ra>
// kernel: tpu_custom_call.1
= control target key start
LH: loop header
LB: loop body
LE: loop exit
PB: predicated region body
PF: predicated region fallthrough
CT: control target
= control target key end

     0   :  { %v1798_v3 = vmov 0.0|0.0   ;;  %vm1799_vm0 = vmmov 0   ;;  %v1800_v8 = vmov 0.0   ;;  %vm53_vm1 = vcmask 261120   ;;  %s2208_s0 = inlined_call_operand.vmem [shape: f32[64,32], index: 0, kind: input, shape index: {}]   ;;  %s2209_s1 = inlined_call_operand.vmem [shape: f32[32,96], index: 1, kind: input, shape index: {}]   ;;  %s2210_s2 = inlined_call_operand.vmem [shape: f32[32,96], index: 2, kind: input, shape index: {}]   ;;  %s2211_s3 = inlined_call_operand.vmem [shape: f32[1,96], index: 3, kind: input, shape index: {}]   ;;  %s2212_s4 = inlined_call_operand.vmem [shape: f32[1,96], index: 4, kind: input, shape index: {}]   ;;  %s2213_s5 = inlined_call_operand.vmem [shape: f32[32,32], index: 5, kind: input, shape index: {}]   ;;  %s2214_s6 = inlined_call_operand.vmem [shape: f32[1,32], index: 6, kind: input, shape index: {}]   ;;  %s2215_s7 = inlined_call_operand.vmem [shape: f32[64,32], index: 7, kind: output, shape index: {0}]   ;;  %s2216_s8 = inlined_call_operand.hbm [shape: f32[8,32], index: 8, kind: output, shape index: {1}]  }
   0x1   :  { %v37_v0 = vld [vmem:[%s2209_s1] sm:$0xff]  ;;  %v38_v1 = vld [vmem:[%s2209_s1 + $0x8] sm:$0xff]  ;;  %1612 = vmatprep.subr.bf16.mxu1 %v1798_v3  ;;  %v39_v6 = vld [vmem:[%s2209_s1 + $0x10] sm:$0xff]  ;;  %1513 = vmatprep.mubr.msk.f32.mxu1 %vm1799_vm0, %v1800_v8 }
   0x2   :  { %v41_v2 = vld [vmem:[%s2210_s2] sm:$0xff]  ;;  %v1604_v4 = vpack.c.bf16 %v38_v1, %v37_v0  ;;  %v42_v5 = vld [vmem:[%s2210_s2 + $0x8] sm:$0xff]  ;;  %v40_v7 = vld [vmem:[%s2209_s1 + $0x18] sm:$0xff] }
   0x3   :  { %v1874_v9 = vpack.c.bf16 %v42_v5, %v41_v2  ;;  %v1608_v10 = vpack.c.bf16 %v40_v7, %v39_v6  ;;  %v43_v11 = vld [vmem:[%s2210_s2 + $0x10] sm:$0xff]  ;;  %v44_v12 = vld [vmem:[%s2210_s2 + $0x18] sm:$0xff]  ;;  %v29_v13 = vld [vmem:[%s2208_s0] sm:$0xff] }
   0x4   :  { %1605 = vmatprep.subr.bf16.mxu0 %v1604_v4  ;;  %1493 = vmatprep.mubr.msk.f32.mxu0 %vm53_vm1, %v29_v13  ;;  %v1887_v14 = vpack.c.bf16 %v44_v12, %v43_v11 }
   0x5   :  { %1614 = vmatpush3.bf16.msra.mxu1 %v1874_v9  ;;  %1607 = vmatpush3.bf16.msra.mxu0 %v1604_v4 }
   0x6   :  { %1615 = vmatprep.subr.bf16.mxu1 %v1798_v3  ;;  %1609 = vmatprep.subr.bf16.mxu0 %v1608_v10 }
   0x7   :  { %14 = vsyncpa [#allocation3], 0  ;;  %v30_v15 = vld [vmem:[%s2208_s0 + $0x8] sm:$0xff]  ;;  %v31_v16 = vld [vmem:[%s2208_s0 + $0x10] sm:$0xff]  ;;  %s1804_s17 = smov 80   ;;  %vm320_vm2 = vcmask 261248  }
   0x8   :  { %v32_v17 = vld [vmem:[%s2208_s0 + $0x18] sm:$0xff]  ;;  %v33_v18 = vld [vmem:[%s2208_s0 + $0x20] sm:$0xff]  ;;  %v34_v19 = vld [vmem:[%s2208_s0 + $0x28] sm:$0xff]  ;;  %vm314_vm3 = vcmask 130048   ;;  %s1805_s22 = smov 16   ;;  %s1806_s1 = smov 48  }
   0x9   :  { %1617 = vmatpush3.bf16.msra.mxu1 %v1887_v14  ;;  %1611 = vmatpush3.bf16.msra.mxu0 %v1608_v10  ;;  %v35_v20 = vld [vmem:[%s2208_s0 + $0x30] sm:$0xff]  ;;  %v36_v21 = vld [vmem:[%s2208_s0 + $0x38] sm:$0xff]  ;;  %v1937_v22 = vld [vmem:[%s2212_s4] ss:$0 sm:$0xff]  ;;  %s1801_s0 = smov 96   ;;  %s1803_s4 = smov 112  }
   0xa   :  { %1618 = vmatprep.subr.bf16.mxu1 %v1798_v3  ;;  %1624 = vmatprep.subr.bf16.mxu0 %v1798_v3  ;;  %v1393_v25 = vld [vmem:[%s2211_s3] ss:$0 sm:$0xff]  ;;  %s1802_s3 = smov 32  }
   0xc   :  { %1514 = vmatmul.mubr.f32.vlgmr.msra.gmra.mrb[0].mxu1 %v1800_v8  ;;  %1494 = vmatmul.mubr.msk.f32.vlgmr.msra.gmra.mrb[0].mxu0 %vm53_vm1, %v30_v15 }
   0xd   :  { %1496 = vmatprep.mubr.msk.f32.mxu0 %vm53_vm1, %v31_v16  ;;  %1620 = vmatpush3.bf16.msra.mxu1 %v1874_v9 }
   0xe   :  { %1621 = vmatprep.subr.bf16.mxu1 %v1798_v3  ;;  %1524 = vmatprep.mubr.msk.f32.mxu1 %vm1799_vm0, %v1800_v8 }
   0xf   :  { %1626 = vmatpush3.bf16.msra.mxu0 %v1874_v9 }
  0x10   :  { %1497 = vmatmul.mubr.msk.f32.gmra.mrb[2].mxu0 %vm53_vm1, %v32_v17  ;;  %1627 = vmatprep.subr.bf16.mxu0 %v1798_v3 }
  0x11   :  { %1499 = vmatprep.mubr.msk.f32.mxu0 %vm53_vm1, %v33_v18  ;;  %1623 = vmatpush3.bf16.msra.mxu1 %v1887_v14 }
  0x12   :  { %1630 = vmatprep.subr.bf16.mxu1 %v1798_v3 }
  0x13   :  { %1629 = vmatpush3.bf16.msra.mxu0 %v1887_v14 }
  0x14   :  { %1500 = vmatmul.mubr.msk.f32.gmra.mrb[4].mxu0 %vm53_vm1, %v34_v19  ;;  %1636 = vmatprep.subr.bf16.mxu0 %v1798_v3 }
  0x15   :  { %1502 = vmatprep.mubr.msk.f32.mxu0 %vm53_vm1, %v35_v20 }
  0x18   :  { %1503 = vmatmul.mubr.msk.f32.gmra.mrb[6].mxu0 %vm53_vm1, %v36_v21 }
  0x19   :  { %1535 = vmatprep.mubr.msk.f32.mxu0 %vm1799_vm0, %v1800_v8 }
  0xdf   :  { %v258_v23 = vpop.f32.mrb[0].mxu1  ;;  %v1495_v24 = vpop.f32.mrb[0].mxu0 }
  0xe0   :  { %v259_v26 = vadd.f32 %v1937_v22, %v258_v23  ;;  %v1943_v27 = vadd.f32 %v1495_v24, %v1393_v25  ;;  %v1515_v28 = vpop.f32.mrb[1].mxu1  ;;  %v144_v29 = vpop.f32.mrb[1].mxu0 }
  0xe1   :  { %v1956_v41 = vadd.f32 %v1393_v25, %v144_v29 }
  0xe2   :  { %270 = vrot.lane.b32.xlu0 %v259_v26, %s1801_s0 }
  0xe3   :  { %v1498_v30 = vpop.f32.mrb[2].mxu0  ;;  %v262_v43 = vadd.f32 %v259_v26, %v1956_v41 }
  0xe4   :  { %v1946_v31 = vadd.f32 %v1498_v30, %v1393_v25  ;;  %v154_v32 = vpop.f32.mrb[3].mxu0 }
  0xe5   :  { %v1948_v33 = vadd.f32 %v1393_v25, %v154_v32  ;;  %v1403_v45 = vmul.f32 -1.442695, %v262_v43 }
  0xe7   :  { %v1501_v34 = vpop.f32.mrb[4].mxu0  ;;  %1676 = vpow2.f32 %v1403_v45 }
  0xe8   :  { %v1950_v35 = vadd.f32 %v1501_v34, %v1393_v25  ;;  %v164_v36 = vpop.f32.mrb[5].mxu0 }
  0xe9   :  { %v1952_v37 = vadd.f32 %v1393_v25, %v164_v36 }
  0xeb   :  { %v1504_v38 = vpop.f32.mrb[6].mxu0 }
  0xec   :  { %v174_v39 = vpop.f32.mrb[7].mxu0  ;;  %v1958_v42 = vadd.f32 %v1504_v38, %v1393_v25 }
  0xed   :  { %v1954_v40 = vadd.f32 %v1393_v25, %v174_v39 }
  0xee   :  { %v288_v44 = vadd.f32 %v259_v26, %v1958_v42 }
  0xf0   :  { %v1404_v46 = vmul.f32 -1.442695, %v288_v44 }
  0xf1   :  { %v1677_v47 = vpop.eup %1676 }
  0xf2   :  { %1678 = vpow2.f32 %v1404_v46  ;;  %v266_v49 = vadd.f32 1.0, %v1677_v47 }
  0xf4   :  { %1680 = vrcp.f32 %v266_v49 }
  0xfc   :  { %v1679_v48 = vpop.eup %1678 }
  0xfd   :  { %v292_v50 = vadd.f32 1.0, %v1679_v48 }
  0xfe   :  { %v1681_v51 = vpop.eup %1680 }
  0xff   :  { %1682 = vrcp.f32 %v292_v50  ;;  %v280_v63 = vsub.f32 1.0, %v1681_v51  ;;  %v286_v5 = vmul.f32 0.0, %v1681_v51 }
 0x109   :  { %v1683_v52 = vpop.eup %1682 }
 0x10a   :  { %v302_v62 = vsub.f32 1.0, %v1683_v52  ;;  %v308_v2 = vmul.f32 0.0, %v1683_v52 }
 0x154   :  { %v271_v53 = vpop.permute.xlu0 %270 }
 0x155   :  { %v273_v54 = vmul.f32 %v1681_v51, %v271_v53  ;;  %v295_v55 = vmul.f32 %v1683_v52, %v271_v53 }
 0x157   :  { %297 = vrot.lane.b32.xlu1 %v295_v55, %s1802_s3  ;;  %275 = vrot.lane.b32.xlu0 %v273_v54, %s1802_s3 }
 0x1c9   :  { %v298_v56 = vpop.permute.xlu1 %297  ;;  %v276_v57 = vpop.permute.xlu0 %275 }
 0x1ca   :  { %v300_v58 = vadd.f32 %v298_v56, %v1958_v42  ;;  %v278_v59 = vadd.f32 %v276_v57, %v1956_v41 }
 0x1cc   :  { %1684 = vtanh.f32 %v300_v58 }
 0x1cd   :  { %1686 = vtanh.f32 %v278_v59 }
 0x1d6   :  { %v1685_v60 = vpop.eup %1684 }
 0x1d7   :  { %v1687_v61 = vpop.eup %1686  ;;  %304 = vrot.lane.b32.xlu0 %v1685_v60, %s1803_s4 }
 0x1d8   :  { %282 = vrot.lane.b32.xlu1 %v1687_v61, %s1803_s4 }
 0x249   :  { %v305_v0 = vpop.permute.xlu0 %304 }
 0x24a   :  { %v283_v1 = vpop.permute.xlu1 %282  ;;  %v307_v4 = vmul.f32 %v305_v0, %v302_v62 }
 0x24b   :  { %v285_v6 = vmul.f32 %v283_v1, %v280_v63 }
 0x24c   :  { %v309_v7 = vadd.f32 %v308_v2, %v307_v4 }
 0x24d   :  { %v287_v10 = vadd.f32 %v286_v5, %v285_v6 }
 0x24e   :  { %317 = vrot.lane.b32.xlu0 %v309_v7, %s1804_s17 }
 0x24f   :  { %311 = vrot.lane.b32.xlu1 %v287_v10, %s1803_s4 }
 0x2c0   :  { %v318_v11 = vpop.permute.xlu0 %317 }
 0x2c1   :  { %v312_v12 = vpop.permute.xlu1 %311  ;;  %321 = vst.msk [vmem:[%s2215_s7 + $0x38] sm:$0xff] %vm320_vm2, %v318_v11 }
 0x2c2   :  { %315 = vst.msk [vmem:[%s2215_s7] sm:$0xff] %vm314_vm3, %v312_v12  ;;  %v322_v13 = vsel %vm314_vm3, %v312_v12, %v318_v11 }
 0x2c3   :  { %1525 = vmatmul.mubr.msk.f32.vlgmr.msra.gmra.mrb[2].mxu1 %vm53_vm1, %v322_v13 }
 0x2c4   :  { %1632 = vmatpush3.bf16.msra.mxu1 %v1874_v9  ;;  %1546 = vmatprep.mubr.msk.f32.mxu1 %vm1799_vm0, %v1800_v8 }
 0x2c5   :  { %1633 = vmatprep.subr.bf16.mxu1 %v1798_v3 }
 0x2c8   :  { %1635 = vmatpush3.bf16.msra.mxu1 %v1887_v14 }
 0x2c9   :  { %1642 = vmatprep.subr.bf16.mxu1 %v1798_v3 }
 0x396   :  { %v392_v15 = vpop.f32.mrb[2].mxu1 }
 0x397   :  { %v393_v16 = vadd.f32 %v1937_v22, %v392_v15  ;;  %v1526_v17 = vpop.f32.mrb[3].mxu1 }
 0x399   :  { %404 = vrot.lane.b32.xlu1 %v393_v16, %s1801_s0  ;;  %v396_v18 = vadd.f32 %v393_v16, %v1943_v27  ;;  %v425_v19 = vadd.f32 %v393_v16, %v1954_v40 }
 0x39b   :  { %v1406_v20 = vmul.f32 -1.442695, %v396_v18  ;;  %v1407_v21 = vmul.f32 -1.442695, %v425_v19 }
 0x39d   :  { %1688 = vpow2.f32 %v1406_v20 }
 0x39e   :  { %1690 = vpow2.f32 %v1407_v21 }
 0x3a7   :  { %v1689_v23 = vpop.eup %1688 }
 0x3a8   :  { %v1691_v24 = vpop.eup %1690  ;;  %v400_v25 = vadd.f32 1.0, %v1689_v23 }
 0x3a9   :  { %v429_v26 = vadd.f32 1.0, %v1691_v24 }
 0x3aa   :  { %1692 = vrcp.f32 %v400_v25 }
 0x3ab   :  { %1694 = vrcp.f32 %v429_v26 }
 0x3b4   :  { %v1693_v28 = vpop.eup %1692 }
 0x3b5   :  { %v1695_v29 = vpop.eup %1694  ;;  %v414_v47 = vsub.f32 1.0, %v1693_v28 }
 0x3b6   :  { %v439_v53 = vsub.f32 1.0, %v1695_v29 }
 0x40b   :  { %v405_v30 = vpop.permute.xlu1 %404 }
 0x40c   :  { %v407_v32 = vmul.f32 %v1693_v28, %v405_v30  ;;  %v432_v34 = vmul.f32 %v1695_v29, %v405_v30 }
 0x40e   :  { %434 = vrot.lane.b32.xlu1 %v432_v34, %s1802_s3  ;;  %409 = vrot.lane.b32.xlu0 %v407_v32, %s1802_s3 }
 0x412   :  { %420 = vrot.lane.b32.xlu1 %v322_v13, %s1805_s22 }
 0x416   :  { %445 = vrot.lane.b32.xlu1 %v322_v13, %s1806_s1 }
 0x480   :  { %v410_v36 = vpop.permute.xlu0 %409  ;;  %v435_v38 = vpop.permute.xlu1 %434 }
 0x481   :  { %v412_v39 = vadd.f32 %v410_v36, %v1943_v27  ;;  %v437_v43 = vadd.f32 %v435_v38, %v1954_v40 }
 0x483   :  { %1696 = vtanh.f32 %v412_v39 }
 0x484   :  { %1698 = vtanh.f32 %v437_v43  ;;  %v421_v46 = vpop.permute.xlu1 %420 }
 0x485   :  { %v423_v49 = vmul.f32 %v1693_v28, %v421_v46 }
 0x488   :  { %v446_v51 = vpop.permute.xlu1 %445 }
 0x489   :  { %v448_v55 = vmul.f32 %v1695_v29, %v446_v51 }
 0x48d   :  { %v1697_v44 = vpop.eup %1696 }
 0x48e   :  { %416 = vrot.lane.b32.xlu0 %v1697_v44, %s1803_s4  ;;  %v1699_v45 = vpop.eup %1698 }
 0x492   :  { %441 = vrot.lane.b32.xlu0 %v1699_v45, %s1803_s4 }
 0x500   :  { %v417_v48 = vpop.permute.xlu0 %416 }
 0x501   :  { %v419_v50 = vmul.f32 %v417_v48, %v414_v47 }
 0x503   :  { %v424_v52 = vadd.f32 %v423_v49, %v419_v50 }
 0x504   :  { %v442_v54 = vpop.permute.xlu0 %441 }
 0x505   :  { %v444_v56 = vmul.f32 %v442_v54, %v439_v53  ;;  %451 = vrot.lane.b32.xlu0 %v424_v52, %s1803_s4 }
 0x507   :  { %v449_v57 = vadd.f32 %v448_v55, %v444_v56 }
 0x509   :  { %456 = vrot.lane.b32.xlu1 %v449_v57, %s1804_s17 }
 0x577   :  { %v452_v58 = vpop.permute.xlu0 %451 }
 0x578   :  { %454 = vst.msk [vmem:[%s2215_s7 + $0x8] sm:$0xff] %vm314_vm3, %v452_v58 }
 0x57b   :  { %v457_v59 = vpop.permute.xlu1 %456 }
 0x57c   :  { %459 = vst.msk [vmem:[%s2215_s7 + $0x30] sm:$0xff] %vm320_vm2, %v457_v59  ;;  %v460_v60 = vsel %vm314_vm3, %v452_v58, %v457_v59 }
 0x57d   :  { %1536 = vmatmul.mubr.msk.f32.vlgmr.msra.gmra.mrb[8].mxu0 %vm53_vm1, %v460_v60 }
 0x57e   :  { %1638 = vmatpush3.bf16.msra.mxu0 %v1874_v9  ;;  %1557 = vmatprep.mubr.msk.f32.mxu0 %vm1799_vm0, %v1800_v8 }
 0x57f   :  { %1639 = vmatprep.subr.bf16.mxu0 %v1798_v3 }
 0x582   :  { %1641 = vmatpush3.bf16.msra.mxu0 %v1887_v14 }
 0x583   :  { %1648 = vmatprep.subr.bf16.mxu0 %v1798_v3 }
 0x650   :  { %v530_v61 = vpop.f32.mrb[8].mxu0 }
 0x651   :  { %v531_v62 = vadd.f32 %v1937_v22, %v530_v61  ;;  %v1537_v63 = vpop.f32.mrb[9].mxu0 }
 0x653   :  { %542 = vrot.lane.b32.xlu0 %v531_v62, %s1801_s0  ;;  %v534_v0 = vadd.f32 %v531_v62, %v1948_v33  ;;  %v563_v1 = vadd.f32 %v531_v62, %v1950_v35 }
 0x655   :  { %v1409_v2 = vmul.f32 -1.442695, %v534_v0  ;;  %v1410_v4 = vmul.f32 -1.442695, %v563_v1 }
 0x657   :  { %1700 = vpow2.f32 %v1409_v2 }
 0x658   :  { %1702 = vpow2.f32 %v1410_v4 }
 0x661   :  { %v1701_v5 = vpop.eup %1700 }
 0x662   :  { %v1703_v6 = vpop.eup %1702  ;;  %v538_v7 = vadd.f32 1.0, %v1701_v5 }
 0x663   :  { %v567_v10 = vadd.f32 1.0, %v1703_v6 }
 0x664   :  { %1704 = vrcp.f32 %v538_v7 }
 0x665   :  { %1706 = vrcp.f32 %v567_v10 }
 0x66e   :  { %v1705_v11 = vpop.eup %1704 }
 0x66f   :  { %v1707_v12 = vpop.eup %1706  ;;  %v552_v25 = vsub.f32 1.0, %v1705_v11 }
 0x670   :  { %v577_v34 = vsub.f32 1.0, %v1707_v12 }
 0x6c5   :  { %v543_v13 = vpop.permute.xlu0 %542 }
 0x6c6   :  { %v545_v15 = vmul.f32 %v1705_v11, %v543_v13  ;;  %v570_v16 = vmul.f32 %v1707_v12, %v543_v13 }
 0x6c8   :  { %572 = vrot.lane.b32.xlu0 %v570_v16, %s1802_s3  ;;  %547 = vrot.lane.b32.xlu1 %v545_v15, %s1802_s3 }
 0x6cc   :  { %558 = vrot.lane.b32.xlu0 %v460_v60, %s1805_s22 }
 0x6d0   :  { %583 = vrot.lane.b32.xlu0 %v460_v60, %s1806_s1 }
 0x73a   :  { %v548_v17 = vpop.permute.xlu1 %547  ;;  %v573_v18 = vpop.permute.xlu0 %572 }
 0x73b   :  { %v550_v19 = vadd.f32 %v548_v17, %v1948_v33  ;;  %v575_v20 = vadd.f32 %v573_v18, %v1950_v35 }
 0x73d   :  { %1708 = vtanh.f32 %v550_v19 }
 0x73e   :  { %1710 = vtanh.f32 %v575_v20  ;;  %v559_v24 = vpop.permute.xlu0 %558 }
 0x73f   :  { %v561_v28 = vmul.f32 %v1705_v11, %v559_v24 }
 0x742   :  { %v584_v30 = vpop.permute.xlu0 %583 }
 0x743   :  { %v586_v38 = vmul.f32 %v1707_v12, %v584_v30 }
 0x747   :  { %v1709_v21 = vpop.eup %1708 }
 0x748   :  { %554 = vrot.lane.b32.xlu1 %v1709_v21, %s1803_s4  ;;  %v1711_v23 = vpop.eup %1710 }
 0x74c   :  { %579 = vrot.lane.b32.xlu1 %v1711_v23, %s1803_s4 }
 0x7ba   :  { %v555_v26 = vpop.permute.xlu1 %554 }
 0x7bb   :  { %v557_v29 = vmul.f32 %v555_v26, %v552_v25 }
 0x7bd   :  { %v562_v32 = vadd.f32 %v561_v28, %v557_v29 }
 0x7be   :  { %v580_v36 = vpop.permute.xlu1 %579 }
 0x7bf   :  { %v582_v39 = vmul.f32 %v580_v36, %v577_v34  ;;  %589 = vrot.lane.b32.xlu1 %v562_v32, %s1803_s4 }
 0x7c1   :  { %v587_v43 = vadd.f32 %v586_v38, %v582_v39 }
 0x7c3   :  { %594 = vrot.lane.b32.xlu0 %v587_v43, %s1804_s17 }
 0x831   :  { %v590_v44 = vpop.permute.xlu1 %589 }
 0x832   :  { %592 = vst.msk [vmem:[%s2215_s7 + $0x10] sm:$0xff] %vm314_vm3, %v590_v44 }
 0x835   :  { %v595_v45 = vpop.permute.xlu0 %594 }
 0x836   :  { %597 = vst.msk [vmem:[%s2215_s7 + $0x28] sm:$0xff] %vm320_vm2, %v595_v45  ;;  %v598_v46 = vsel %vm314_vm3, %v590_v44, %v595_v45 }
 0x837   :  { %1547 = vmatmul.mubr.msk.f32.vlgmr.msra.gmra.mrb[4].mxu1 %vm53_vm1, %v598_v46 }
 0x838   :  { %1644 = vmatpush3.bf16.msra.mxu1 %v1874_v9  ;;  %1568 = vmatprep.mubr.msk.f32.mxu1 %vm1799_vm0, %v1800_v8 }
 0x839   :  { %1645 = vmatprep.subr.bf16.mxu1 %v1798_v3 }
 0x83c   :  { %1647 = vmatpush3.bf16.msra.mxu1 %v1887_v14 }
 0x83d   :  { %1654 = vmatprep.subr.bf16.mxu1 %v1798_v3 }
 0x90a   :  { %v668_v47 = vpop.f32.mrb[4].mxu1 }
 0x90b   :  { %v669_v48 = vadd.f32 %v1937_v22, %v668_v47  ;;  %v1548_v49 = vpop.f32.mrb[5].mxu1 }
 0x90d   :  { %680 = vrot.lane.b32.xlu1 %v669_v48, %s1801_s0  ;;  %v672_v50 = vadd.f32 %v669_v48, %v1946_v31  ;;  %v701_v51 = vadd.f32 %v669_v48, %v1952_v37 }
 0x90f   :  { %v1412_v52 = vmul.f32 -1.442695, %v672_v50  ;;  %v1413_v53 = vmul.f32 -1.442695, %v701_v51 }
 0x911   :  { %1712 = vpow2.f32 %v1412_v52 }
 0x912   :  { %1714 = vpow2.f32 %v1413_v53 }
 0x91b   :  { %v1713_v54 = vpop.eup %1712 }
 0x91c   :  { %v1715_v55 = vpop.eup %1714  ;;  %v676_v56 = vadd.f32 1.0, %v1713_v54 }
 0x91d   :  { %v705_v57 = vadd.f32 1.0, %v1715_v55 }
 0x91e   :  { %1716 = vrcp.f32 %v676_v56 }
 0x91f   :  { %1718 = vrcp.f32 %v705_v57 }
 0x928   :  { %v1717_v58 = vpop.eup %1716 }
 0x929   :  { %v1719_v59 = vpop.eup %1718  ;;  %v690_v7 = vsub.f32 1.0, %v1717_v58 }
 0x92a   :  { %v715_v16 = vsub.f32 1.0, %v1719_v59 }
 0x97f   :  { %v681_v60 = vpop.permute.xlu1 %680 }
 0x980   :  { %v683_v61 = vmul.f32 %v1717_v58, %v681_v60  ;;  %v708_v62 = vmul.f32 %v1719_v59, %v681_v60 }
 0x982   :  { %710 = vrot.lane.b32.xlu1 %v708_v62, %s1802_s3  ;;  %685 = vrot.lane.b32.xlu0 %v683_v61, %s1802_s3 }
 0x986   :  { %696 = vrot.lane.b32.xlu1 %v598_v46, %s1805_s22 }
 0x98a   :  { %721 = vrot.lane.b32.xlu1 %v598_v46, %s1806_s1 }
 0x9f4   :  { %v686_v63 = vpop.permute.xlu0 %685  ;;  %v711_v0 = vpop.permute.xlu1 %710 }
 0x9f5   :  { %v688_v1 = vadd.f32 %v686_v63, %v1946_v31  ;;  %v713_v2 = vadd.f32 %v711_v0, %v1952_v37 }
 0x9f7   :  { %1720 = vtanh.f32 %v688_v1 }
 0x9f8   :  { %1722 = vtanh.f32 %v713_v2  ;;  %v697_v6 = vpop.permute.xlu1 %696 }
 0x9f9   :  { %v699_v11 = vmul.f32 %v1717_v58, %v697_v6 }
 0x9fc   :  { %v722_v13 = vpop.permute.xlu1 %721 }
 0x9fd   :  { %v724_v18 = vmul.f32 %v1719_v59, %v722_v13 }
 0xa01   :  { %v1721_v4 = vpop.eup %1720 }
 0xa02   :  { %692 = vrot.lane.b32.xlu0 %v1721_v4, %s1803_s4  ;;  %v1723_v5 = vpop.eup %1722 }
 0xa06   :  { %717 = vrot.lane.b32.xlu0 %v1723_v5, %s1803_s4 }
 0xa74   :  { %v693_v10 = vpop.permute.xlu0 %692 }
 0xa75   :  { %v695_v12 = vmul.f32 %v693_v10, %v690_v7 }
 0xa77   :  { %v700_v15 = vadd.f32 %v699_v11, %v695_v12 }
 0xa78   :  { %v718_v17 = vpop.permute.xlu0 %717 }
 0xa79   :  { %v720_v19 = vmul.f32 %v718_v17, %v715_v16  ;;  %727 = vrot.lane.b32.xlu0 %v700_v15, %s1803_s4 }
 0xa7b   :  { %v725_v20 = vadd.f32 %v724_v18, %v720_v19 }
 0xa7d   :  { %732 = vrot.lane.b32.xlu1 %v725_v20, %s1804_s17 }
 0xaeb   :  { %v728_v21 = vpop.permute.xlu0 %727 }
 0xaec   :  { %730 = vst.msk [vmem:[%s2215_s7 + $0x18] sm:$0xff] %vm314_vm3, %v728_v21 }
 0xaef   :  { %v733_v23 = vpop.permute.xlu1 %732 }
 0xaf0   :  { %735 = vst.msk [vmem:[%s2215_s7 + $0x20] sm:$0xff] %vm320_vm2, %v733_v23  ;;  %v736_v24 = vsel %vm314_vm3, %v728_v21, %v733_v23 }
 0xaf1   :  { %1558 = vmatmul.mubr.msk.f32.vlgmr.msra.gmra.mrb[10].mxu0 %vm53_vm1, %v736_v24 }
 0xaf2   :  { %1650 = vmatpush3.bf16.msra.mxu0 %v1874_v9  ;;  %1579 = vmatprep.mubr.msk.f32.mxu0 %vm1799_vm0, %v1800_v8 }
 0xaf3   :  { %1651 = vmatprep.subr.bf16.mxu0 %v1798_v3 }
 0xaf6   :  { %1653 = vmatpush3.bf16.msra.mxu0 %v1887_v14 }
 0xaf7   :  { %1660 = vmatprep.subr.bf16.mxu0 %v1798_v3 }
 0xbc4   :  { %v806_v25 = vpop.f32.mrb[10].mxu0 }
 0xbc5   :  { %v807_v26 = vadd.f32 %v1937_v22, %v806_v25  ;;  %v1559_v28 = vpop.f32.mrb[11].mxu0 }
 0xbc7   :  { %818 = vrot.lane.b32.xlu0 %v807_v26, %s1801_s0  ;;  %v810_v29 = vadd.f32 %v807_v26, %v1952_v37  ;;  %v839_v30 = vadd.f32 %v807_v26, %v1946_v31 }
 0xbc9   :  { %v1415_v32 = vmul.f32 -1.442695, %v810_v29  ;;  %v1416_v34 = vmul.f32 -1.442695, %v839_v30 }
 0xbcb   :  { %1724 = vpow2.f32 %v1415_v32 }
 0xbcc   :  { %1726 = vpow2.f32 %v1416_v34 }
 0xbd5   :  { %v1725_v36 = vpop.eup %1724 }
 0xbd6   :  { %v1727_v38 = vpop.eup %1726  ;;  %v814_v39 = vadd.f32 1.0, %v1725_v36 }
 0xbd7   :  { %v843_v43 = vadd.f32 1.0, %v1727_v38 }
 0xbd8   :  { %1728 = vrcp.f32 %v814_v39 }
 0xbd9   :  { %1730 = vrcp.f32 %v843_v43 }
 0xbe2   :  { %v1729_v44 = vpop.eup %1728 }
 0xbe3   :  { %v1731_v45 = vpop.eup %1730  ;;  %v828_v56 = vsub.f32 1.0, %v1729_v44 }
 0xbe4   :  { %v853_v62 = vsub.f32 1.0, %v1731_v45 }
 0xc39   :  { %v819_v46 = vpop.permute.xlu0 %818 }
 0xc3a   :  { %v821_v47 = vmul.f32 %v1729_v44, %v819_v46  ;;  %v846_v48 = vmul.f32 %v1731_v45, %v819_v46 }
 0xc3c   :  { %848 = vrot.lane.b32.xlu0 %v846_v48, %s1802_s3  ;;  %823 = vrot.lane.b32.xlu1 %v821_v47, %s1802_s3 }
 0xc40   :  { %834 = vrot.lane.b32.xlu0 %v736_v24, %s1805_s22 }
 0xc44   :  { %859 = vrot.lane.b32.xlu0 %v736_v24, %s1806_s1 }
 0xcae   :  { %v824_v49 = vpop.permute.xlu1 %823  ;;  %v849_v50 = vpop.permute.xlu0 %848 }
 0xcaf   :  { %v826_v51 = vadd.f32 %v824_v49, %v1952_v37  ;;  %v851_v52 = vadd.f32 %v849_v50, %v1946_v31 }
 0xcb1   :  { %1732 = vtanh.f32 %v826_v51 }
 0xcb2   :  { %1734 = vtanh.f32 %v851_v52  ;;  %v835_v55 = vpop.permute.xlu0 %834 }
 0xcb3   :  { %v837_v58 = vmul.f32 %v1729_v44, %v835_v55 }
 0xcb6   :  { %v860_v60 = vpop.permute.xlu0 %859 }
 0xcb7   :  { %v862_v37 = vmul.f32 %v1731_v45, %v860_v60 }
 0xcbb   :  { %v1733_v53 = vpop.eup %1732 }
 0xcbc   :  { %830 = vrot.lane.b32.xlu1 %v1733_v53, %s1803_s4  ;;  %v1735_v54 = vpop.eup %1734 }
 0xcc0   :  { %855 = vrot.lane.b32.xlu1 %v1735_v54, %s1803_s4 }
 0xd2e   :  { %v831_v57 = vpop.permute.xlu1 %830 }
 0xd2f   :  { %v833_v59 = vmul.f32 %v831_v57, %v828_v56 }
 0xd31   :  { %v838_v61 = vadd.f32 %v837_v58, %v833_v59 }
 0xd32   :  { %v856_v63 = vpop.permute.xlu1 %855 }
 0xd33   :  { %v858_v0 = vmul.f32 %v856_v63, %v853_v62  ;;  %865 = vrot.lane.b32.xlu1 %v838_v61, %s1803_s4 }
 0xd35   :  { %v863_v31 = vadd.f32 %v862_v37, %v858_v0 }
 0xd37   :  { %870 = vrot.lane.b32.xlu0 %v863_v31, %s1804_s17 }
 0xda5   :  { %v866_v1 = vpop.permute.xlu1 %865 }
 0xda6   :  { %868 = vst.msk [vmem:[%s2215_s7 + $0x20] sm:$0xff] %vm314_vm3, %v866_v1 }
 0xda9   :  { %v871_v2 = vpop.permute.xlu0 %870 }
 0xdaa   :  { %873 = vst.msk [vmem:[%s2215_s7 + $0x18] sm:$0xff] %vm320_vm2, %v871_v2  ;;  %v874_v4 = vsel %vm314_vm3, %v866_v1, %v871_v2 }
 0xdab   :  { %1569 = vmatmul.mubr.msk.f32.vlgmr.msra.gmra.mrb[6].mxu1 %vm53_vm1, %v874_v4 }
 0xdac   :  { %1656 = vmatpush3.bf16.msra.mxu1 %v1874_v9  ;;  %1590 = vmatprep.mubr.msk.f32.mxu1 %vm1799_vm0, %v1800_v8 }
 0xdad   :  { %1657 = vmatprep.subr.bf16.mxu1 %v1798_v3 }
 0xdb0   :  { %1659 = vmatpush3.bf16.msra.mxu1 %v1887_v14 }
 0xe7e   :  { %v944_v5 = vpop.f32.mrb[6].mxu1 }
 0xe7f   :  { %v945_v6 = vadd.f32 %v1937_v22, %v944_v5  ;;  %v1570_v7 = vpop.f32.mrb[7].mxu1 }
 0xe81   :  { %956 = vrot.lane.b32.xlu1 %v945_v6, %s1801_s0  ;;  %v948_v10 = vadd.f32 %v945_v6, %v1950_v35  ;;  %v977_v11 = vadd.f32 %v945_v6, %v1948_v33 }
 0xe83   :  { %v1418_v12 = vmul.f32 -1.442695, %v948_v10  ;;  %v1419_v13 = vmul.f32 -1.442695, %v977_v11 }
 0xe85   :  { %1736 = vpow2.f32 %v1418_v12 }
 0xe86   :  { %1738 = vpow2.f32 %v1419_v13 }
 0xe8f   :  { %v1737_v9 = vpop.eup %1736 }
 0xe90   :  { %v1739_v15 = vpop.eup %1738  ;;  %v952_v16 = vadd.f32 1.0, %v1737_v9 }
 0xe91   :  { %v981_v17 = vadd.f32 1.0, %v1739_v15 }
 0xe92   :  { %1740 = vrcp.f32 %v952_v16 }
 0xe93   :  { %1742 = vrcp.f32 %v981_v17 }
 0xe9c   :  { %v1741_v14 = vpop.eup %1740 }
 0xe9d   :  { %v1743_v18 = vpop.eup %1742  ;;  %v966_v32 = vsub.f32 1.0, %v1741_v14 }
 0xe9e   :  { %v991_v44 = vsub.f32 1.0, %v1743_v18 }
 0xef3   :  { %v957_v19 = vpop.permute.xlu1 %956 }
 0xef4   :  { %v959_v20 = vmul.f32 %v1741_v14, %v957_v19  ;;  %v984_v21 = vmul.f32 %v1743_v18, %v957_v19 }
 0xef6   :  { %986 = vrot.lane.b32.xlu1 %v984_v21, %s1802_s3  ;;  %961 = vrot.lane.b32.xlu0 %v959_v20, %s1802_s3 }
 0xefa   :  { %972 = vrot.lane.b32.xlu1 %v874_v4, %s1805_s22 }
 0xefe   :  { %997 = vrot.lane.b32.xlu1 %v874_v4, %s1806_s1 }
 0xf68   :  { %v962_v23 = vpop.permute.xlu0 %961  ;;  %v987_v24 = vpop.permute.xlu1 %986 }
 0xf69   :  { %v964_v25 = vadd.f32 %v962_v23, %v1950_v35  ;;  %v989_v26 = vadd.f32 %v987_v24, %v1948_v33 }
 0xf6b   :  { %1744 = vtanh.f32 %v964_v25 }
 0xf6c   :  { %1746 = vtanh.f32 %v989_v26  ;;  %v973_v30 = vpop.permute.xlu1 %972 }
 0xf6d   :  { %v975_v36 = vmul.f32 %v1741_v14, %v973_v30 }
 0xf70   :  { %v998_v39 = vpop.permute.xlu1 %997 }
 0xf71   :  { %v1000_v35 = vmul.f32 %v1743_v18, %v998_v39 }
 0xf75   :  { %v1745_v28 = vpop.eup %1744 }
 0xf76   :  { %968 = vrot.lane.b32.xlu0 %v1745_v28, %s1803_s4  ;;  %v1747_v29 = vpop.eup %1746 }
 0xf7a   :  { %993 = vrot.lane.b32.xlu0 %v1747_v29, %s1803_s4 }
 0xfe8   :  { %v969_v34 = vpop.permute.xlu0 %968 }
 0xfe9   :  { %v971_v38 = vmul.f32 %v969_v34, %v966_v32 }
 0xfeb   :  { %v976_v43 = vadd.f32 %v975_v36, %v971_v38 }
 0xfec   :  { %v994_v45 = vpop.permute.xlu0 %993 }
 0xfed   :  { %v996_v46 = vmul.f32 %v994_v45, %v991_v44  ;;  %1003 = vrot.lane.b32.xlu0 %v976_v43, %s1803_s4 }
 0xfef   :  { %v1001_v33 = vadd.f32 %v1000_v35, %v996_v46 }
 0xff1   :  { %1008 = vrot.lane.b32.xlu1 %v1001_v33, %s1804_s17  ;;  %v1289_v33 = vld [vmem:[%s2213_s5] sm:$0xff] }
0x105f   :  { %v1004_v47 = vpop.permute.xlu0 %1003 }
0x1060   :  { %1006 = vst.msk [vmem:[%s2215_s7 + $0x28] sm:$0xff] %vm314_vm3, %v1004_v47 }
0x1063   :  { %v1009_v48 = vpop.permute.xlu1 %1008 }
0x1064   :  { %1011 = vst.msk [vmem:[%s2215_s7 + $0x10] sm:$0xff] %vm320_vm2, %v1009_v48  ;;  %v1012_v49 = vsel %vm314_vm3, %v1004_v47, %v1009_v48  ;;  %v1290_v47 = vld [vmem:[%s2213_s5 + $0x8] sm:$0xff] }
0x1065   :  { %1580 = vmatmul.mubr.msk.f32.vlgmr.msra.gmra.mrb[12].mxu0 %vm53_vm1, %v1012_v49  ;;  %v1661_v48 = vpack.c.bf16 %v1290_v47, %v1289_v33 }
0x1066   :  { %1601 = vmatprep.mubr.msk.f32.mxu0 %vm1799_vm0, %v1800_v8 }
0x1067   :  { %1662 = vmatpush3.bf16.msra.mxu0 %v1661_v48 }
0x1068   :  { %1663 = vmatprep.subr.bf16.mxu0 %v1798_v3 }
0x1138   :  { %v1082_v50 = vpop.f32.mrb[12].mxu0 }
0x1139   :  { %v1083_v51 = vadd.f32 %v1937_v22, %v1082_v50  ;;  %v1581_v52 = vpop.f32.mrb[13].mxu0  ;;  %v1292_v50 = vld [vmem:[%s2213_s5 + $0x18] sm:$0xff] }
0x113b   :  { %1094 = vrot.lane.b32.xlu0 %v1083_v51, %s1801_s0  ;;  %v1086_v53 = vadd.f32 %v1083_v51, %v1954_v40  ;;  %v1115_v54 = vadd.f32 %v1083_v51, %v1943_v27 }
0x113d   :  { %v1421_v55 = vmul.f32 -1.442695, %v1086_v53  ;;  %v1422_v56 = vmul.f32 -1.442695, %v1115_v54 }
0x113f   :  { %1748 = vpow2.f32 %v1421_v55 }
0x1140   :  { %1750 = vpow2.f32 %v1422_v56 }
0x1149   :  { %v1749_v57 = vpop.eup %1748 }
0x114a   :  { %v1751_v58 = vpop.eup %1750  ;;  %v1090_v59 = vadd.f32 1.0, %v1749_v57 }
0x114b   :  { %v1119_v60 = vadd.f32 1.0, %v1751_v58 }
0x114c   :  { %1752 = vrcp.f32 %v1090_v59 }
0x114d   :  { %1754 = vrcp.f32 %v1119_v60 }
0x1156   :  { %v1753_v8 = vpop.eup %1752 }
0x1157   :  { %v1755_v61 = vpop.eup %1754  ;;  %v1104_v7 = vsub.f32 1.0, %v1753_v8 }
0x1158   :  { %v1129_v15 = vsub.f32 1.0, %v1755_v61 }
0x11ad   :  { %v1095_v62 = vpop.permute.xlu0 %1094 }
0x11ae   :  { %v1097_v63 = vmul.f32 %v1753_v8, %v1095_v62  ;;  %v1122_v37 = vmul.f32 %v1755_v61, %v1095_v62 }
0x11b0   :  { %1124 = vrot.lane.b32.xlu0 %v1122_v37, %s1802_s3  ;;  %1099 = vrot.lane.b32.xlu1 %v1097_v63, %s1802_s3 }
0x11b4   :  { %1110 = vrot.lane.b32.xlu0 %v1012_v49, %s1805_s22 }
0x11b8   :  { %1135 = vrot.lane.b32.xlu0 %v1012_v49, %s1806_s1 }
0x1222   :  { %v1100_v0 = vpop.permute.xlu1 %1099  ;;  %v1125_v31 = vpop.permute.xlu0 %1124 }
0x1223   :  { %v1102_v1 = vadd.f32 %v1100_v0, %v1954_v40  ;;  %v1127_v2 = vadd.f32 %v1125_v31, %v1943_v27  ;;  %v1426_v0 = vld [vmem:[%s2214_s6] ss:$0 sm:$0xff] }
0x1225   :  { %1756 = vtanh.f32 %v1102_v1 }
0x1226   :  { %1758 = vtanh.f32 %v1127_v2  ;;  %v1111_v6 = vpop.permute.xlu0 %1110 }
0x1227   :  { %v1113_v11 = vmul.f32 %v1753_v8, %v1111_v6 }
0x122a   :  { %v1136_v13 = vpop.permute.xlu0 %1135 }
0x122b   :  { %v1138_v40 = vmul.f32 %v1755_v61, %v1136_v13 }
0x122f   :  { %v1757_v4 = vpop.eup %1756 }
0x1230   :  { %1106 = vrot.lane.b32.xlu1 %v1757_v4, %s1803_s4  ;;  %v1759_v5 = vpop.eup %1758 }
0x1234   :  { %1131 = vrot.lane.b32.xlu1 %v1759_v5, %s1803_s4 }
0x12a2   :  { %v1107_v10 = vpop.permute.xlu1 %1106 }
0x12a3   :  { %v1109_v12 = vmul.f32 %v1107_v10, %v1104_v7 }
0x12a5   :  { %v1114_v9 = vadd.f32 %v1113_v11, %v1109_v12 }
0x12a6   :  { %v1132_v16 = vpop.permute.xlu1 %1131 }
0x12a7   :  { %v1134_v17 = vmul.f32 %v1132_v16, %v1129_v15  ;;  %1141 = vrot.lane.b32.xlu1 %v1114_v9, %s1803_s4 }
0x12a9   :  { %v1139_v27 = vadd.f32 %v1138_v40, %v1134_v17 }
0x12ab   :  { %1146 = vrot.lane.b32.xlu0 %v1139_v27, %s1804_s17 }
0x1319   :  { %v1142_v14 = vpop.permute.xlu1 %1141 }
0x131a   :  { %1144 = vst.msk [vmem:[%s2215_s7 + $0x30] sm:$0xff] %vm314_vm3, %v1142_v14 }
0x131d   :  { %v1147_v18 = vpop.permute.xlu0 %1146 }
0x131e   :  { %1149 = vst.msk [vmem:[%s2215_s7 + $0x8] sm:$0xff] %vm320_vm2, %v1147_v18  ;;  %v1150_v19 = vsel %vm314_vm3, %v1142_v14, %v1147_v18 }
0x131f   :  { %1591 = vmatmul.mubr.msk.f32.vlgmr.msra.gmra.mrb[8].mxu1 %vm53_vm1, %v1150_v19 }
0x13f2   :  { %v1220_v20 = vpop.f32.mrb[8].mxu1 }
0x13f3   :  { %v1221_v21 = vadd.f32 %v1937_v22, %v1220_v20  ;;  %v1592_v23 = vpop.f32.mrb[9].mxu1 }
0x13f5   :  { %1232 = vrot.lane.b32.xlu1 %v1221_v21, %s1801_s0  ;;  %v1224_v24 = vadd.f32 %v1221_v21, %v1958_v42  ;;  %v1253_v25 = vadd.f32 %v1221_v21, %v1956_v41 }
0x13f7   :  { %v1424_v26 = vmul.f32 -1.442695, %v1224_v24  ;;  %v1425_v28 = vmul.f32 -1.442695, %v1253_v25 }
0x13f9   :  { %1760 = vpow2.f32 %v1424_v26 }
0x13fa   :  { %1762 = vpow2.f32 %v1425_v28 }
0x1403   :  { %v1761_v29 = vpop.eup %1760 }
0x1404   :  { %v1763_v30 = vpop.eup %1762  ;;  %v1228_v32 = vadd.f32 1.0, %v1761_v29 }
0x1405   :  { %v1257_v34 = vadd.f32 1.0, %v1763_v30 }
0x1406   :  { %1764 = vrcp.f32 %v1228_v32 }
0x1407   :  { %1766 = vrcp.f32 %v1257_v34 }
0x1410   :  { %v1765_v36 = vpop.eup %1764 }
0x1411   :  { %v1767_v38 = vpop.eup %1766  ;;  %v1242_v53 = vsub.f32 1.0, %v1765_v36 }
0x1412   :  { %v1267_v58 = vsub.f32 1.0, %v1767_v38 }
0x1467   :  { %v1233_v22 = vpop.permute.xlu1 %1232 }
0x1468   :  { %v1235_v39 = vmul.f32 %v1765_v36, %v1233_v22  ;;  %v1260_v43 = vmul.f32 %v1767_v38, %v1233_v22 }
0x146a   :  { %1262 = vrot.lane.b32.xlu1 %v1260_v43, %s1802_s3  ;;  %1237 = vrot.lane.b32.xlu0 %v1235_v39, %s1802_s3 }
0x146e   :  { %1248 = vrot.lane.b32.xlu1 %v1150_v19, %s1805_s22 }
0x1472   :  { %1273 = vrot.lane.b32.xlu1 %v1150_v19, %s1806_s1 }
0x14dc   :  { %v1238_v44 = vpop.permute.xlu0 %1237  ;;  %v1263_v45 = vpop.permute.xlu1 %1262 }
0x14dd   :  { %v1240_v35 = vadd.f32 %v1238_v44, %v1958_v42  ;;  %v1265_v46 = vadd.f32 %v1263_v45, %v1956_v41  ;;  %v1291_v41 = vld [vmem:[%s2213_s5 + $0x10] sm:$0xff] }
0x14de   :  { %v1664_v51 = vpack.c.bf16 %v1292_v50, %v1291_v41 }
0x14df   :  { %1768 = vtanh.f32 %v1240_v35 }
0x14e0   :  { %1770 = vtanh.f32 %v1265_v46  ;;  %1665 = vmatpush3.bf16.msra.mxu0 %v1664_v51  ;;  %v1249_v52 = vpop.permute.xlu1 %1248 }
0x14e1   :  { %v1251_v55 = vmul.f32 %v1765_v36, %v1249_v52 }
0x14e4   :  { %v1274_v56 = vpop.permute.xlu1 %1273 }
0x14e5   :  { %v1276_v60 = vmul.f32 %v1767_v38, %v1274_v56 }
0x14e9   :  { %v1769_v49 = vpop.eup %1768 }
0x14ea   :  { %1244 = vrot.lane.b32.xlu0 %v1769_v49, %s1803_s4  ;;  %v1771_v42 = vpop.eup %1770 }
0x14ee   :  { %1269 = vrot.lane.b32.xlu0 %v1771_v42, %s1803_s4 }
0x155c   :  { %v1245_v54 = vpop.permute.xlu0 %1244 }
0x155d   :  { %v1247_v3 = vmul.f32 %v1245_v54, %v1242_v53 }
0x155f   :  { %v1252_v57 = vadd.f32 %v1251_v55, %v1247_v3 }
0x1560   :  { %v1270_v59 = vpop.permute.xlu0 %1269 }
0x1561   :  { %v1272_v8 = vmul.f32 %v1270_v59, %v1267_v58  ;;  %1279 = vrot.lane.b32.xlu0 %v1252_v57, %s1803_s4 }
0x1563   :  { %v1277_v61 = vadd.f32 %v1276_v60, %v1272_v8 }
0x1565   :  { %1284 = vrot.lane.b32.xlu1 %v1277_v61, %s1804_s17  ;;  %s1807_s17 = smov [#allocation2]  }
0x1566   :  { %s1383_s11 = sshll.u32 %s1807_s17, 4  ;;  %s1384_s11 = int_to_ptr.vmem [resolvable:$true] %s1383_s11 }
0x1567   :  { %s1774_s12 = scalar_lea.vmem %s1384_s11, 128  ;;  %p1779_p1 = scmp.lt.s32.totalorder %s1384_s11, %s1384_s11 }
0x1568   :  { %p1775_p0 = scmp.ne.s32.totalorder %s1384_s11, %s1774_s12  ;;  %p1780_p2 = scmp.lt.s32.totalorder %s1774_s12, %s1774_s12 }
0x156a   :  { %p1781_p3 = por %p1780_p2, %p1779_p1 }
0x156c   :  { %p1782_p4 = pnand %p1781_p3, %p1775_p0 }
0x15d3   :  { %v1280_v62 = vpop.permute.xlu0 %1279 }
0x15d4   :  { %1282 = vst.msk [vmem:[%s2215_s7 + $0x38] sm:$0xff] %vm314_vm3, %v1280_v62 }
0x15d7   :  { %v1285_v63 = vpop.permute.xlu1 %1284 }
0x15d8   :  { %1287 = vst.msk [vmem:[%s2215_s7] sm:$0xff] %vm320_vm2, %v1285_v63  ;;  %v1288_v37 = vsel %vm314_vm3, %v1280_v62, %v1285_v63 }
0x15d9   :  { %1602 = vmatmul.mubr.msk.f32.vlgmr.msra.gmra.mrb[14].mxu0 %vm53_vm1, %v1288_v37 }
0x16ac   :  { %v1369_v31 = vpop.f32.mrb[14].mxu0 }
0x16ad   :  { %v1370_v1 = vadd.f32 %v1426_v0, %v1369_v31  ;;  %v1603_v2 = vpop.f32.mrb[15].mxu0 }
0x16af   :  { %1772 = vtanh.f32 %v1370_v1 }
0x16b9   :  { %v1773_v4 = vpop.eup %1772 }
0x16ba   :  { %1374 = vst.msk [vmem:[#allocation2] sm:$0xff] %vm53_vm1, %v1773_v4 }
0x16bb   :  { %1785 = shalt.err (!%p1782_p4)
}
0x16bc   :  { %s1786_s6 = scalar_lea.hbm %s2216_s8, 128 }
0x16bd   :  { %p1787_p5 = scmp.ne.s32.totalorder %s2216_s8, %s1786_s6  ;;  %p1790_p6 = scmp.lt.u32.totalorder %s1786_s6, %s2216_s8 }
0x16bf   :  { %p1792_p7 = pnand %p1790_p6, %p1787_p5 }
0x16c1   :  { %1795 = shalt.err (!%p1792_p7)
}
0x16c2   :  { %1386 = dma.vmem_to_hbm [thread:$0]  %s1384_s11, 128, %s2216_s8, [#allocation3]  }
0x16c3   :  { %1796 = dma.done.wait [#allocation3], 128  }
0x16c4   :  { %1797 = vsyncadd [#allocation3], 4294967168 }
0x16c5   :  { %1392 = vsyncpa [#allocation3], 1 }

</bundles_post_ra>
